<compile_context>
chip_gen: v6e
topology: v6e:2x2x1
jax: 0.10.0
libtpu: 0.0.40
codegen_flags: <defaults>
</compile_context>

<pallas_src>
import jax
import jax.numpy as jnp
from jax import lax
from jax.experimental import pallas as pl
from jax.experimental.pallas import tpu as pltpu

NEG = -10000.0
_LANE = 128


def _round_up(x, m):
    return ((x + m - 1) // m) * m


def _pick_tile(padded, pref=256):
    # `padded` is a multiple of 128, so this always terminates at a divisor.
    t = min(padded, pref)
    while padded % t:
        t -= _LANE
    return t


def _pad_to(x, shape):
    pads = [(0, t - s) for s, t in zip(x.shape, shape)]
    if all(p == (0, 0) for p in pads):
        return x
    return jnp.pad(x, pads)


def _compiler_params(step_bytes, ndims=2):
    # Explicit scoped-VMEM limit with headroom for double-buffering and
    # compute intermediates, capped at 64 MiB so the same request is valid on
    # v7x (64 MiB physical VMEM per TensorCore).
    limit = int(min(64 * 1024 * 1024, max(32 * 1024 * 1024, 3 * step_bytes)))
    return pltpu.CompilerParams(
        dimension_semantics=("parallel",) * ndims,
        vmem_limit_bytes=limit)


# --------------------------- kernels --------------------------------------


def _decoder_attn_kernel(sim_ref, enc_bias_ref, enc_seq_ref, ctx_ref, att_ref):
    # sim_ref: (1, TLd, Le)  enc_bias_ref: (1, 1, Le)  enc_seq_ref: (1, Le, De)
    logits = sim_ref[0] + enc_bias_ref[0]                  # (TLd, Le)
    m = jnp.max(logits, axis=-1, keepdims=True)
    p = jnp.exp(logits - m)
    denom = jnp.sum(p, axis=-1, keepdims=True)
    att = p * pl.reciprocal(denom, approx=False)           # softmax over encoder axis
    att_ref[0] = att
    ctx_ref[0] = jnp.dot(att, enc_seq_ref[0], preferred_element_type=jnp.float32)


def _encoder_attn_kernel(sim_ref, enc_bias_ref, dec_bias_ref, dec_seq_ref,
                         ctx_ref, att_ref):
    # Untransposed (Ld, TLe) slab: softmax over the decoder axis is an axis-0
    # reduction; the transpose of the big sim tile is absorbed into
    # dot_general (the MXU contracts the Ld axis directly).  Only the per-tile
    # att output needs a transposed write.
    # sim_ref: (1, Ld, TLe)  enc_bias_ref: (1, 1, TLe)  dec_bias_ref: (1, Ld, 1)
    logits = sim_ref[0] + enc_bias_ref[0] + dec_bias_ref[0]    # (Ld, TLe)
    m = jnp.max(logits, axis=0, keepdims=True)
    p = jnp.exp(logits - m)
    denom = jnp.sum(p, axis=0, keepdims=True)
    att = p * pl.reciprocal(denom, approx=False)           # softmax over decoder axis
    ctx_ref[0] = lax.dot_general(
        att, dec_seq_ref[0],
        dimension_numbers=(((0,), (0,)), ((), ())),
        preferred_element_type=jnp.float32)                # (TLe, Dd)
    att_ref[0] = att.T                                     # (TLe, Ld)


def _bidir_fused_kernel(sim_ref, enc_bias_ref, dec_bias_ref, enc_seq_ref,
                        dec_seq_ref, dec_ctx_ref, dec_att_ref,
                        enc_ctx_ref, enc_att_ref):
    # One grid step per batch element: sim is read from HBM once and the
    # encoder-masked logits are shared by both softmax directions.
    # sim_ref: (1, Ld, Le)  enc_bias_ref: (1, 1, Le)  dec_bias_ref: (1, Ld, 1)
    # enc_seq_ref: (1, Le, De)  dec_seq_ref: (1, Ld, Dd)
    logits_d = sim_ref[0] + enc_bias_ref[0]                # (Ld, Le)

    # Decoder direction: softmax over the encoder axis (rows).
    m_d = jnp.max(logits_d, axis=-1, keepdims=True)
    p_d = jnp.exp(logits_d - m_d)
    att_d = p_d * pl.reciprocal(jnp.sum(p_d, axis=-1, keepdims=True),
                                approx=False)
    dec_att_ref[0] = att_d
    dec_ctx_ref[0] = jnp.dot(att_d, enc_seq_ref[0],
                             preferred_element_type=jnp.float32)

    # Encoder direction: add decoder-mask bias, softmax over the decoder axis
    # (axis 0 of the untransposed slab); transpose absorbed into dot_general.
    logits_e = logits_d + dec_bias_ref[0]                  # (Ld, Le)
    m_e = jnp.max(logits_e, axis=0, keepdims=True)
    p_e = jnp.exp(logits_e - m_e)
    att_e = p_e * pl.reciprocal(jnp.sum(p_e, axis=0, keepdims=True),
                                approx=False)
    enc_ctx_ref[0] = lax.dot_general(
        att_e, dec_seq_ref[0],
        dimension_numbers=(((0,), (0,)), ((), ())),
        preferred_element_type=jnp.float32)                # (Le, Dd)
    enc_att_ref[0] = att_e.T                               # (Le, Ld)


# --------------------------- wrapper ---------------------------------------


def attention_forward(similarity_matrix, encoder_seq, decoder_seq,
                      encoder_mask=None, decoder_mask=None,
                      bidirectional=False, allow_fused=True):
    similarity_matrix = similarity_matrix.astype(jnp.float32)
    encoder_seq = encoder_seq.astype(jnp.float32)
    decoder_seq = decoder_seq.astype(jnp.float32)

    B, Ld, Le = similarity_matrix.shape
    De = encoder_seq.shape[-1]
    Dd = decoder_seq.shape[-1]

    # None masks are equivalent to all-ones masks (penalty term vanishes).
    if encoder_mask is None:
        encoder_mask = jnp.ones((B, Le), jnp.float32)
    if decoder_mask is None:
        decoder_mask = jnp.ones((B, Ld), jnp.float32)

    # Lane-dense padding: every dim reaching HBM becomes a multiple of 128.
    Ld_p, Le_p = _round_up(Ld, _LANE), _round_up(Le, _LANE)
    De_p, Dd_p = _round_up(De, _LANE), _round_up(Dd, _LANE)

    sim_p = _pad_to(similarity_matrix, (B, Ld_p, Le_p))
    enc_seq_p = _pad_to(encoder_seq, (B, Le_p, De_p))
    dec_seq_p = _pad_to(decoder_seq, (B, Ld_p, Dd_p))
    enc_mask_p = _pad_to(encoder_mask.astype(jnp.float32), (B, Le_p))
    dec_mask_p = _pad_to(decoder_mask.astype(jnp.float32), (B, Ld_p))

    # Precomputed additive mask biases (padded positions get the full penalty,
    # so their softmax weights underflow to exactly 0).
    enc_bias = ((1.0 - enc_mask_p) * NEG).reshape(B, 1, Le_p)
    dec_bias = ((1.0 - dec_mask_p) * NEG).reshape(B, Ld_p, 1)

    f32 = jnp.float32

    # --- fused bidirectional path: one sim read, both directions per batch ---
    if bidirectional and allow_fused:
        fused_step_bytes = 4 * (2 * Ld_p * Le_p            # sim + dec_att
                                + Le_p + Ld_p              # biases
                                + Le_p * De_p + Ld_p * Dd_p  # seqs
                                + Ld_p * De_p + Le_p * Dd_p  # ctxs
                                + Le_p * Ld_p)             # enc_att
        use_fused = 2 * fused_step_bytes <= 28 * 1024 * 1024
    else:
        use_fused = False

    if use_fused:
        dec_ctx_p, dec_att_p, enc_ctx_p, enc_att_p = pl.pallas_call(
            _bidir_fused_kernel,
            out_shape=(jax.ShapeDtypeStruct((B, Ld_p, De_p), f32),
                       jax.ShapeDtypeStruct((B, Ld_p, Le_p), f32),
                       jax.ShapeDtypeStruct((B, Le_p, Dd_p), f32),
                       jax.ShapeDtypeStruct((B, Le_p, Ld_p), f32)),
            grid_spec=pltpu.PrefetchScalarGridSpec(
                num_scalar_prefetch=0,
                grid=(B,),
                in_specs=[
                    pl.BlockSpec((1, Ld_p, Le_p), lambda b: (b, 0, 0)),
                    pl.BlockSpec((1, 1, Le_p), lambda b: (b, 0, 0)),
                    pl.BlockSpec((1, Ld_p, 1), lambda b: (b, 0, 0)),
                    pl.BlockSpec((1, Le_p, De_p), lambda b: (b, 0, 0)),
                    pl.BlockSpec((1, Ld_p, Dd_p), lambda b: (b, 0, 0)),
                ],
                out_specs=[
                    pl.BlockSpec((1, Ld_p, De_p), lambda b: (b, 0, 0)),
                    pl.BlockSpec((1, Ld_p, Le_p), lambda b: (b, 0, 0)),
                    pl.BlockSpec((1, Le_p, Dd_p), lambda b: (b, 0, 0)),
                    pl.BlockSpec((1, Le_p, Ld_p), lambda b: (b, 0, 0)),
                ],
            ),
            compiler_params=_compiler_params(fused_step_bytes, ndims=1),
        )(sim_p, enc_bias, dec_bias, enc_seq_p, dec_seq_p)
        return (enc_ctx_p[:, :Le, :Dd], dec_ctx_p[:, :Ld, :De],
                enc_att_p[:, :Le, :Ld], dec_att_p[:, :Ld, :Le])

    # --- decoder direction: softmax over encoder axis, ctx = att @ enc_seq ---
    TLd = _pick_tile(Ld_p)
    n_ld = Ld_p // TLd
    dec_step_bytes = 4 * (2 * TLd * Le_p + Le_p + Le_p * De_p + TLd * De_p)
    dec_ctx_p, dec_att_p = pl.pallas_call(
        _decoder_attn_kernel,
        out_shape=(jax.ShapeDtypeStruct((B, Ld_p, De_p), f32),
                   jax.ShapeDtypeStruct((B, Ld_p, Le_p), f32)),
        grid_spec=pltpu.PrefetchScalarGridSpec(
            num_scalar_prefetch=0,
            grid=(B, n_ld),
            in_specs=[
                pl.BlockSpec((1, TLd, Le_p), lambda b, i: (b, i, 0)),
                pl.BlockSpec((1, 1, Le_p), lambda b, i: (b, 0, 0)),
                pl.BlockSpec((1, Le_p, De_p), lambda b, i: (b, 0, 0)),
            ],
            out_specs=[
                pl.BlockSpec((1, TLd, De_p), lambda b, i: (b, i, 0)),
                pl.BlockSpec((1, TLd, Le_p), lambda b, i: (b, i, 0)),
            ],
        ),
        compiler_params=_compiler_params(dec_step_bytes, ndims=2),
    )(sim_p, enc_bias, enc_seq_p)

    dec_ctx = dec_ctx_p[:, :Ld, :De]
    dec_att = dec_att_p[:, :Ld, :Le]

    if not bidirectional:
        return dec_ctx, dec_att

    # --- encoder direction: softmax over decoder axis, ctx = att^T @ dec_seq ---
    TLe = _pick_tile(Le_p)
    n_le = Le_p // TLe
    enc_step_bytes = 4 * (2 * Ld_p * TLe + TLe + Ld_p + Ld_p * Dd_p + TLe * Dd_p)
    enc_ctx_p, enc_att_p = pl.pallas_call(
        _encoder_attn_kernel,
        out_shape=(jax.ShapeDtypeStruct((B, Le_p, Dd_p), f32),
                   jax.ShapeDtypeStruct((B, Le_p, Ld_p), f32)),
        grid_spec=pltpu.PrefetchScalarGridSpec(
            num_scalar_prefetch=0,
            grid=(B, n_le),
            in_specs=[
                pl.BlockSpec((1, Ld_p, TLe), lambda b, j: (b, 0, j)),
                pl.BlockSpec((1, 1, TLe), lambda b, j: (b, 0, j)),
                pl.BlockSpec((1, Ld_p, 1), lambda b, j: (b, 0, 0)),
                pl.BlockSpec((1, Ld_p, Dd_p), lambda b, j: (b, 0, 0)),
            ],
            out_specs=[
                pl.BlockSpec((1, TLe, Dd_p), lambda b, j: (b, j, 0)),
                pl.BlockSpec((1, TLe, Ld_p), lambda b, j: (b, j, 0)),
            ],
        ),
        compiler_params=_compiler_params(enc_step_bytes, ndims=2),
    )(sim_p, enc_bias, dec_bias, dec_seq_p)

    enc_ctx = enc_ctx_p[:, :Le, :Dd]
    enc_att = enc_att_p[:, :Le, :Ld]
    return enc_ctx, dec_ctx, enc_att, dec_att


# --------------------------- reference & test -------------------------------


def _reference(similarity_matrix, encoder_seq, decoder_seq, encoder_mask,
               decoder_mask, bidirectional):
    sim = similarity_matrix + (1.0 - encoder_mask[:, None, :]) * NEG
    dec_att = jax.nn.softmax(sim, axis=-1)
    dec_ctx = jnp.einsum("bde,bef->bdf", dec_att, encoder_seq)
    if not bidirectional:
        return dec_ctx, dec_att
    simT = jnp.swapaxes(sim, 1, 2) + (1.0 - decoder_mask[:, None, :]) * NEG
    enc_att = jax.nn.softmax(simT, axis=-1)
    enc_ctx = jnp.einsum("bed,bdf->bef", enc_att, decoder_seq)
    return enc_ctx, dec_ctx, enc_att, dec_att


if __name__ == "__main__":
    key = jax.random.PRNGKey(0)
    k1, k2, k3 = jax.random.split(key, 3)

    B, Ld, Le, De, Dd = 2, 8, 16, 32, 32
    similarity_matrix = jax.random.normal(k1, (B, Ld, Le), jnp.float32)
    encoder_seq = jax.random.normal(k2, (B, Le, De), jnp.float32)
    decoder_seq = jax.random.normal(k3, (B, Ld, Dd), jnp.float32)

    # Masks with trailing padded positions zeroed out.
    encoder_mask = jnp.concatenate(
        [jnp.ones((B, Le - 4), jnp.float32), jnp.zeros((B, 4), jnp.float32)], axis=1)
    decoder_mask = jnp.concatenate(
        [jnp.ones((B, Ld - 2), jnp.float32), jnp.zeros((B, 2), jnp.float32)], axis=1)

    # Exercise: fused bidirectional, tiled bidirectional, and unidirectional.
    outs_bi_fused = attention_forward(similarity_matrix, encoder_seq, decoder_seq,
                                      encoder_mask, decoder_mask,
                                      bidirectional=True, allow_fused=True)
    outs_bi_tiled = attention_forward(similarity_matrix, encoder_seq, decoder_seq,
                                      encoder_mask, decoder_mask,
                                      bidirectional=True, allow_fused=False)
    outs_uni = attention_forward(similarity_matrix, encoder_seq, decoder_seq,
                                 encoder_mask, decoder_mask, bidirectional=False)
    outs_bi_fused = jax.block_until_ready(outs_bi_fused)
    outs_bi_tiled = jax.block_until_ready(outs_bi_tiled)
    outs_uni = jax.block_until_ready(outs_uni)

    refs_bi = _reference(similarity_matrix, encoder_seq, decoder_seq,
                         encoder_mask, decoder_mask, True)
    refs_uni = _reference(similarity_matrix, encoder_seq, decoder_seq,
                          encoder_mask, decoder_mask, False)
    for got, ref in zip(list(outs_bi_fused) + list(outs_bi_tiled) + list(outs_uni),
                        list(refs_bi) + list(refs_bi) + list(refs_uni)):
        assert got.shape == ref.shape, (got.shape, ref.shape)
        assert jnp.max(jnp.abs(got - ref)) < 2e-4

    print("KERNEL_OK")
</pallas_src>

<mosaic_0001>
module attributes {stable_mosaic.version = 11 : i64} {
  func.func @_bidir_fused_kernel(%arg0: i32, %arg1: memref<1x128x128xf32, #tpu.memory_space<vmem>>, %arg2: memref<1x1x128xf32, #tpu.memory_space<vmem>>, %arg3: memref<1x128x1xf32, #tpu.memory_space<vmem>>, %arg4: memref<1x128x128xf32, #tpu.memory_space<vmem>>, %arg5: memref<1x128x128xf32, #tpu.memory_space<vmem>>, %arg6: memref<1x128x128xf32, #tpu.memory_space<vmem>>, %arg7: memref<1x128x128xf32, #tpu.memory_space<vmem>>, %arg8: memref<1x128x128xf32, #tpu.memory_space<vmem>>, %arg9: memref<1x128x128xf32, #tpu.memory_space<vmem>>) attributes {dimension_semantics = [#tpu.dimension_semantics<parallel>], iteration_bounds = array<i64: 2>, scalar_prefetch = 0 : i64, scratch_operands = 0 : i64, tpu.core_type = #tpu.core_type<tc>, window_params = [{transform_indices = @transform_0, window_bounds = array<i64: 1, 128, 128>}, {transform_indices = @transform_1, window_bounds = array<i64: 1, 1, 128>}, {transform_indices = @transform_2, window_bounds = array<i64: 1, 128, 1>}, {transform_indices = @transform_3, window_bounds = array<i64: 1, 128, 128>}, {transform_indices = @transform_4, window_bounds = array<i64: 1, 128, 128>}, {transform_indices = @transform_5, window_bounds = array<i64: 1, 128, 128>}, {transform_indices = @transform_6, window_bounds = array<i64: 1, 128, 128>}, {transform_indices = @transform_7, window_bounds = array<i64: 1, 128, 128>}, {transform_indices = @transform_8, window_bounds = array<i64: 1, 128, 128>}]} {
    %c0 = arith.constant 0 : index
    %c0_0 = arith.constant 0 : index
    %c0_1 = arith.constant 0 : index
    %0 = vector.load %arg1[%c0, %c0_0, %c0_1] : memref<1x128x128xf32, #tpu.memory_space<vmem>>, vector<1x128x128xf32>
    %1 = vector.shape_cast %0 : vector<1x128x128xf32> to vector<128x128xf32>
    %c0_2 = arith.constant 0 : index
    %c0_3 = arith.constant 0 : index
    %c0_4 = arith.constant 0 : index
    %2 = vector.load %arg2[%c0_2, %c0_3, %c0_4] : memref<1x1x128xf32, #tpu.memory_space<vmem>>, vector<1x1x128xf32>
    %3 = vector.shape_cast %2 : vector<1x1x128xf32> to vector<1x128xf32>
    %4 = vector.broadcast %3 : vector<1x128xf32> to vector<128x128xf32>
    %5 = arith.addf %1, %4 : vector<128x128xf32>
    %cst = arith.constant dense<0xFF800000> : vector<128xf32>
    %6 = vector.multi_reduction <maximumf>, %5, %cst [1] : vector<128x128xf32> to vector<128xf32>
    %7 = vector.shape_cast %6 : vector<128xf32> to vector<128x1xf32>
    %8 = vector.broadcast %7 : vector<128x1xf32> to vector<128x128xf32>
    %9 = arith.subf %5, %8 : vector<128x128xf32>
    %10 = math.exp %9 : vector<128x128xf32>
    %cst_5 = arith.constant dense<0.000000e+00> : vector<128xf32>
    %11 = vector.multi_reduction <add>, %10, %cst_5 [1] : vector<128x128xf32> to vector<128xf32>
    %12 = vector.shape_cast %11 : vector<128xf32> to vector<128x1xf32>
    %13 = tpu.reciprocal %12 : vector<128x1xf32> -> vector<128x1xf32>
    %14 = vector.broadcast %13 : vector<128x1xf32> to vector<128x128xf32>
    %15 = arith.mulf %10, %14 : vector<128x128xf32>
    %c0_6 = arith.constant 0 : index
    %c0_7 = arith.constant 0 : index
    %c0_8 = arith.constant 0 : index
    %16 = vector.load %arg7[%c0_6, %c0_7, %c0_8] : memref<1x128x128xf32, #tpu.memory_space<vmem>>, vector<1x128x128xf32>
    %17 = vector.shape_cast %16 : vector<1x128x128xf32> to vector<128x128xf32>
    %18 = vector.shape_cast %15 : vector<128x128xf32> to vector<1x128x128xf32>
    tpu.vector_store %arg7[%c0_6, %c0_7, %c0_8], %18 {strides = array<i32>} : memref<1x128x128xf32, #tpu.memory_space<vmem>>, vector<1x128x128xf32>,
    %c0_9 = arith.constant 0 : index
    %c0_10 = arith.constant 0 : index
    %c0_11 = arith.constant 0 : index
    %19 = vector.load %arg4[%c0_9, %c0_10, %c0_11] : memref<1x128x128xf32, #tpu.memory_space<vmem>>, vector<1x128x128xf32>
    %20 = vector.shape_cast %19 : vector<1x128x128xf32> to vector<128x128xf32>
    %cst_12 = arith.constant dense<0.000000e+00> : vector<128x128xf32>
    %21 = tpu.matmul %15, %20, %cst_12 {dimension_numbers = #tpu.dot_dimension_numbers<[1], [0], [0], [1], [0, 0, 1, 1], [], []>} : vector<128x128xf32>, vector<128x128xf32>, vector<128x128xf32> -> vector<128x128xf32>
    %c0_13 = arith.constant 0 : index
    %c0_14 = arith.constant 0 : index
    %c0_15 = arith.constant 0 : index
    %22 = vector.load %arg6[%c0_13, %c0_14, %c0_15] : memref<1x128x128xf32, #tpu.memory_space<vmem>>, vector<1x128x128xf32>
    %23 = vector.shape_cast %22 : vector<1x128x128xf32> to vector<128x128xf32>
    %24 = vector.shape_cast %21 : vector<128x128xf32> to vector<1x128x128xf32>
    tpu.vector_store %arg6[%c0_13, %c0_14, %c0_15], %24 {strides = array<i32>} : memref<1x128x128xf32, #tpu.memory_space<vmem>>, vector<1x128x128xf32>,
    %c0_16 = arith.constant 0 : index
    %c0_17 = arith.constant 0 : index
    %c0_18 = arith.constant 0 : index
    %25 = vector.load %arg3[%c0_16, %c0_17, %c0_18] : memref<1x128x1xf32, #tpu.memory_space<vmem>>, vector<1x128x1xf32>
    %26 = vector.shape_cast %25 : vector<1x128x1xf32> to vector<128x1xf32>
    %27 = vector.broadcast %26 : vector<128x1xf32> to vector<128x128xf32>
    %28 = arith.addf %5, %27 : vector<128x128xf32>
    %cst_19 = arith.constant dense<0xFF800000> : vector<128xf32>
    %29 = vector.multi_reduction <maximumf>, %28, %cst_19 [0] : vector<128x128xf32> to vector<128xf32>
    %30 = vector.shape_cast %29 : vector<128xf32> to vector<1x128xf32>
    %31 = vector.broadcast %30 : vector<1x128xf32> to vector<128x128xf32>
    %32 = arith.subf %28, %31 : vector<128x128xf32>
    %33 = math.exp %32 : vector<128x128xf32>
    %cst_20 = arith.constant dense<0.000000e+00> : vector<128xf32>
    %34 = vector.multi_reduction <add>, %33, %cst_20 [0] : vector<128x128xf32> to vector<128xf32>
    %35 = vector.shape_cast %34 : vector<128xf32> to vector<1x128xf32>
    %36 = tpu.reciprocal %35 : vector<1x128xf32> -> vector<1x128xf32>
    %37 = vector.broadcast %36 : vector<1x128xf32> to vector<128x128xf32>
    %38 = arith.mulf %33, %37 : vector<128x128xf32>
    %c0_21 = arith.constant 0 : index
    %c0_22 = arith.constant 0 : index
    %c0_23 = arith.constant 0 : index
    %39 = vector.load %arg5[%c0_21, %c0_22, %c0_23] : memref<1x128x128xf32, #tpu.memory_space<vmem>>, vector<1x128x128xf32>
    %40 = vector.shape_cast %39 : vector<1x128x128xf32> to vector<128x128xf32>
    %cst_24 = arith.constant dense<0.000000e+00> : vector<128x128xf32>
    %41 = tpu.matmul %38, %40, %cst_24 {dimension_numbers = #tpu.dot_dimension_numbers<[0], [0], [1], [1], [0, 1, 1, 1], [], []>} : vector<128x128xf32>, vector<128x128xf32>, vector<128x128xf32> -> vector<128x128xf32>
    %c0_25 = arith.constant 0 : index
    %c0_26 = arith.constant 0 : index
    %c0_27 = arith.constant 0 : index
    %42 = vector.load %arg8[%c0_25, %c0_26, %c0_27] : memref<1x128x128xf32, #tpu.memory_space<vmem>>, vector<1x128x128xf32>
    %43 = vector.shape_cast %42 : vector<1x128x128xf32> to vector<128x128xf32>
    %44 = vector.shape_cast %41 : vector<128x128xf32> to vector<1x128x128xf32>
    tpu.vector_store %arg8[%c0_25, %c0_26, %c0_27], %44 {strides = array<i32>} : memref<1x128x128xf32, #tpu.memory_space<vmem>>, vector<1x128x128xf32>,
    %45 = tpu.transpose %38, [1, 0] : vector<128x128xf32> -> vector<128x128xf32>
    %c0_28 = arith.constant 0 : index
    %c0_29 = arith.constant 0 : index
    %c0_30 = arith.constant 0 : index
    %46 = vector.load %arg9[%c0_28, %c0_29, %c0_30] : memref<1x128x128xf32, #tpu.memory_space<vmem>>, vector<1x128x128xf32>
    %47 = vector.shape_cast %46 : vector<1x128x128xf32> to vector<128x128xf32>
    %48 = vector.shape_cast %45 : vector<128x128xf32> to vector<1x128x128xf32>
    tpu.vector_store %arg9[%c0_28, %c0_29, %c0_30], %48 {strides = array<i32>} : memref<1x128x128xf32, #tpu.memory_space<vmem>>, vector<1x128x128xf32>,
    return
  }
  func.func @transform_0(%arg0: i32) -> (i32, i32, i32) {
    %c0_i32 = arith.constant 0 : i32
    %c0_i32_0 = arith.constant 0 : i32
    %c0_i32_1 = arith.constant 0 : i32
    return %arg0, %c0_i32, %c0_i32_0 : i32, i32, i32
  }
  func.func @transform_1(%arg0: i32) -> (i32, i32, i32) {
    %c0_i32 = arith.constant 0 : i32
    %c0_i32_0 = arith.constant 0 : i32
    %c0_i32_1 = arith.constant 0 : i32
    return %arg0, %c0_i32, %c0_i32_0 : i32, i32, i32
  }
  func.func @transform_2(%arg0: i32) -> (i32, i32, i32) {
    %c0_i32 = arith.constant 0 : i32
    %c0_i32_0 = arith.constant 0 : i32
    %c0_i32_1 = arith.constant 0 : i32
    return %arg0, %c0_i32, %c0_i32_0 : i32, i32, i32
  }
  func.func @transform_3(%arg0: i32) -> (i32, i32, i32) {
    %c0_i32 = arith.constant 0 : i32
    %c0_i32_0 = arith.constant 0 : i32
    %c0_i32_1 = arith.constant 0 : i32
    return %arg0, %c0_i32, %c0_i32_0 : i32, i32, i32
  }
  func.func @transform_4(%arg0: i32) -> (i32, i32, i32) {
    %c0_i32 = arith.constant 0 : i32
    %c0_i32_0 = arith.constant 0 : i32
    %c0_i32_1 = arith.constant 0 : i32
    return %arg0, %c0_i32, %c0_i32_0 : i32, i32, i32
  }
  func.func @transform_5(%arg0: i32) -> (i32, i32, i32) {
    %c0_i32 = arith.constant 0 : i32
    %c0_i32_0 = arith.constant 0 : i32
    %c0_i32_1 = arith.constant 0 : i32
    return %arg0, %c0_i32, %c0_i32_0 : i32, i32, i32
  }
  func.func @transform_6(%arg0: i32) -> (i32, i32, i32) {
    %c0_i32 = arith.constant 0 : i32
    %c0_i32_0 = arith.constant 0 : i32
    %c0_i32_1 = arith.constant 0 : i32
    return %arg0, %c0_i32, %c0_i32_0 : i32, i32, i32
  }
  func.func @transform_7(%arg0: i32) -> (i32, i32, i32) {
    %c0_i32 = arith.constant 0 : i32
    %c0_i32_0 = arith.constant 0 : i32
    %c0_i32_1 = arith.constant 0 : i32
    return %arg0, %c0_i32, %c0_i32_0 : i32, i32, i32
  }
  func.func @transform_8(%arg0: i32) -> (i32, i32, i32) {
    %c0_i32 = arith.constant 0 : i32
    %c0_i32_0 = arith.constant 0 : i32
    %c0_i32_1 = arith.constant 0 : i32
    return %arg0, %c0_i32, %c0_i32_0 : i32, i32, i32
  }
}

</mosaic_0001>

<bundles_post_ra>
// kernel: tpu_custom_call.1
= control target key start
LH: loop header
LB: loop body
LE: loop exit
PB: predicated region body
PF: predicated region fallthrough
CT: control target
= control target key end

     0   :  { %s2986_s0 = inlined_call_operand.vmem [shape: f32[2,128,128], index: 0, kind: input, shape index: {}]   ;;  %s2987_s1 = inlined_call_operand.vmem [shape: f32[2,1,128], index: 1, kind: input, shape index: {}]   ;;  %s2988_s2 = inlined_call_operand.vmem [shape: f32[2,128,1], index: 2, kind: input, shape index: {}]   ;;  %s2989_s3 = inlined_call_operand.hbm [shape: f32[2,128,128], index: 3, kind: input, shape index: {}]   ;;  %s2990_s4 = inlined_call_operand.hbm [shape: f32[2,128,128], index: 4, kind: input, shape index: {}]   ;;  %s2991_s5 = inlined_call_operand.hbm [shape: f32[2,128,128], index: 5, kind: output, shape index: {0}]   ;;  %s2992_s6 = inlined_call_operand.hbm [shape: f32[2,128,128], index: 6, kind: output, shape index: {1}]   ;;  %s2993_s7 = inlined_call_operand.hbm [shape: f32[2,128,128], index: 7, kind: output, shape index: {2}]   ;;  %s2994_s8 = inlined_call_operand.hbm [shape: f32[2,128,128], index: 8, kind: output, shape index: {3}]  }
   0x1   :  { %3004 = sst [smem:[#allocation20_spill]] %s2989_s3 }
   0x2   :  { %14 = vsyncpa [#allocation3], 0 }
   0x3   :  { %16 = vsyncpa [#allocation3 + $0x1], 0 }
   0x4   :  { %17 = vsyncpa [#allocation6], 0 }
   0x5   :  { %19 = vsyncpa [#allocation6 + $0x1], 0 }
   0x6   :  { %20 = vsyncpa [#allocation4], 0 }
   0x7   :  { %22 = vsyncpa [#allocation4 + $0x1], 0 }
   0x8   :  { %23 = vsyncpa [#allocation9], 0 }
   0x9   :  { %25 = vsyncpa [#allocation9 + $0x1], 0 }
   0xa   :  { %26 = vsyncpa [#allocation12], 0 }
   0xb   :  { %28 = vsyncpa [#allocation12 + $0x1], 0  ;;  %s2223_s27 = smov 0   ;;  %s2225_s28 = smov 0  }
   0xc   :  { %s2227_s29 = smov 0   ;;  %s2229_s30 = smov 0  }
   0xd LB: > { %3005 = sst [smem:[#allocation18_spill]] %s2161_s29  ;;  %s2244_s9 = sadd.s32 4294967295, %s2165_s30   ;;  %s2165_s30 = sphi %s2229_s30, %s3028_s30   ;;  %s2161_s29 = sphi %s2227_s29, %s3025_s29   ;;  %s2157_s28 = sphi %s2225_s28, %s3027_s28   ;;  %s2153_s27 = sphi %s2223_s27, %s3026_s27  }
   0xe   : > { %s2995_s10 = sadd.s32 4294967294, %s2165_s30   ;;  %s2248_s11 = sadd.s32 1, %s2165_s30  }
   0xf   : > { %s119_s12 = sadd.s32 1, %s2161_s29  ;;  %s116_s13 = ssub.s32 %s2165_s30, %s2248_s11 }
  0x10   : > { %p126_p0 = scmp.ne.s32.totalorder %s2161_s29, %s2157_s28  ;;  %p117_p1 = scmp.eq.s32.totalorder %s116_s13, 0 }
  0x11   : > { %p127_p2 = scmp.eq.s32.totalorder %s2165_s30, 0  ;;  %p132_p3 = scmp.ne.s32.totalorder %s2157_s28, %s2153_s27 }
  0x12   : > { %p133_p4 = scmp.eq.s32.totalorder %s2244_s9, 0  ;;  %p182_p7 = scmp.eq.s32.totalorder %s2244_s9, 1 }
  0x13   : > { %s2260_s14 = scalar_select %p117_p1, %s2161_s29, %s119_s12  }
  0x14   : > { %p2262_p5 = por %p127_p2, %p126_p0  ;;  %p2266_p6 = por %p133_p4, %p132_p3 }
  0x15   : > { %3006 = sst [smem:[#allocation19_spill]] %s2260_s14  ;;  %p188_p8 = scmp.eq.s32.totalorder %s2995_s10, 1 }
  0x16   : > { %s3008_s16 = scalar_select %p2266_p6, 1, 0 }
  0x17   : > { %p1816_p10 = scmp.lt.s32.totalorder %s2165_s30, 2  ;;  %p2275_p11 = por %p182_p7, %p126_p0 }
  0x18   : > { %p2279_p12 = por %p188_p8, %p132_p3  ;;  %s2284_s19 = sand.u32 1, %s2161_s29  }
  0x19   : > { %s3009_s17 = scalar_select %p2275_p11, 1, 0 }
  0x1a   : > { %s3010_s18 = scalar_select %p2279_p12, 1, 0 }
  0x1b   : > { %s2997_s20 = sshll.u32 %s2165_s30, 11  ;;  %s2996_s21 = sshll.u32 %s2284_s19, 7 }
  0x1c   : > { %s3011_s3 = sld [smem:[#allocation20_spill]]  ;;  %s312_s25 = scalar_lea.vmem [#allocation2], %s2996_s21 }
  0x1d   : > { %s319_s26 = sshll.u32 %s312_s25, 4  ;;  %p2299_p13 = pnand %p1816_p10, %p2262_p5  ;;  %s2303_s26 = int_to_ptr.vmem [resolvable:$true] %s319_s26 }
  0x1f   : > { %p1957_p1 = pneg %p2299_p13 }
  0x22   : > { %s2293_s24 = scalar_lea.hbm %s3011_s3, %s2997_s20  ;;  %s1960_s15 = scalar_lea.hbm %s3011_s3, 4096 }
  0x23   : > { %s1955_s10 = scalar_lea.hbm %s2293_s24, 2048  ;;  %p1961_p4 = scmp.lt.s32.totalorder %s2293_s24, %s3011_s3 }
  0x24   : > { %p1956_p0 = scmp.ne.s32.totalorder %s2293_s24, %s1955_s10  ;;  %p1962_p5 = scmp.lt.s32.totalorder %s1960_s15, %s1955_s10 }
  0x26   : > { %p1958_p2 = pnand %p1957_p1, %p1956_p0  ;;  %p1963_p7 = por %p1962_p5, %p1961_p4 }
  0x28   : > { %p1959_p3 = pneg %p1958_p2 }
  0x2a   : > { %p1964_p8 = pnand %p1963_p7, %p1959_p3 }
  0x2c   : > { %1967 = shalt.err (!%p1964_p8)
}
  0x2d   : > { %s1968_s20 = scalar_lea.vmem %s2303_s26, 2048  ;;  %s2167_s22 = smov [#allocation2]  }
  0x2e   : > { %p1969_p10 = scmp.ne.s32.totalorder %s2303_s26, %s1968_s20  ;;  %s1973_s23 = sshll.u32 %s2167_s22, 4  ;;  %s1974_s23 = int_to_ptr.vmem [resolvable:$false] %s1973_s23 }
  0x2f   : > { %s1975_s13 = scalar_lea.vmem %s1974_s23, 4096  ;;  %p1976_p9 = scmp.lt.s32.totalorder %s2303_s26, %s1974_s23 }
  0x30   : > { %p1971_p0 = pnand %p1969_p10, %p1957_p1  ;;  %p1977_p12 = scmp.lt.s32.totalorder %s1975_s13, %s1968_s20 }
  0x32   : > { %p1972_p2 = pneg %p1971_p0  ;;  %p1978_p11 = por %p1977_p12, %p1976_p9 }
  0x34   : > { %p1979_p4 = pnand %p1978_p11, %p1972_p2 }
  0x36   : > { %1982 = shalt.err (!%p1979_p4)
}
  0x37   : > { %s3000_s10 = smov 128   ;;  %s2169_s21 = smov 8  }
  0x38   : > { %s3013_s20 = scalar_lea.sflag [#allocation3], %s2284_s19  ;;  %p1574_p9 = scmp.ge.s32.totalorder %s2165_s30, 1 }
  0x39   : > { %1799 = dma.hbm_to_vmem [thread:$0]  (!%p2299_p13), %s2293_s24, 2048, %s2303_s26, %s3013_s20, %s3000_s10, %s3000_s10, %s2169_s21  }
  0x3a   : > { %p348_p11 = scmp.lt.s32.totalorder %s2165_s30, 3  ;;  %s3015_s15 = sshll.u32 %s2165_s30, 11 }
  0x3b   : > { %s2346_s23 = scalar_lea.hbm %s2990_s4, %s3015_s15  ;;  %s3016_s3 = sshll.u32 %s2284_s19, 7 }
  0x3c   : > { %p2337_p12 = pnand %p1574_p9, %p348_p11  ;;  %s333_s14 = scalar_lea.vmem [#allocation5], %s3016_s3 }
  0x3d   : > { %s340_s29 = sshll.u32 %s333_s14, 4  ;;  %s330_s24 = scalar_lea.sflag [#allocation6], %s2284_s19  ;;  %s2350_s29 = int_to_ptr.vmem [resolvable:$true] %s340_s29 }
  0x3e   : > { %s1983_s26 = scalar_lea.hbm %s2346_s23, 2048  ;;  %s1988_s15 = scalar_lea.hbm %s2990_s4, 4096 }
  0x3f   : > { %p1984_p3 = scmp.ne.s32.totalorder %s2346_s23, %s1983_s26  ;;  %p1989_p8 = scmp.lt.s32.totalorder %s2346_s23, %s2990_s4 }
  0x40   : > { %p1990_p10 = scmp.lt.s32.totalorder %s1988_s15, %s1983_s26 }
  0x41   : > { %p1986_p5 = pnand %p1984_p3, %p1957_p1 }
  0x42   : > { %p1991_p0 = por %p1990_p10, %p1989_p8 }
  0x43   : > { %p1987_p7 = pneg %p1986_p5 }
  0x45   : > { %p1992_p2 = pnand %p1991_p0, %p1987_p7 }
  0x47   : > { %1995 = shalt.err (!%p1992_p2)
}
  0x48   : > { %s1996_s3 = scalar_lea.vmem %s2350_s29, 2048  ;;  %s2170_s14 = smov [#allocation5]  }
  0x49   : > { %p1997_p4 = scmp.ne.s32.totalorder %s2350_s29, %s1996_s3  ;;  %s2001_s19 = sshll.u32 %s2170_s14, 4  ;;  %s2002_s19 = int_to_ptr.vmem [resolvable:$false] %s2001_s19 }
  0x4a   : > { %s2003_s10 = scalar_lea.vmem %s2002_s19, 4096  ;;  %p2004_p3 = scmp.lt.s32.totalorder %s2350_s29, %s2002_s19 }
  0x4b   : > { %p1999_p9 = pnand %p1997_p4, %p1957_p1  ;;  %p2005_p5 = scmp.lt.s32.totalorder %s2003_s10, %s1996_s3 }
  0x4d   : > { %p2000_p11 = pneg %p1999_p9  ;;  %p2006_p6 = por %p2005_p5, %p2004_p3 }
  0x4f   : > { %p2007_p8 = pnand %p2006_p6, %p2000_p11 }
  0x51   : > { %2010 = shalt.err (!%p2007_p8)
}
  0x52   : > { %s3017_s26 = smov 128   ;;  %352 = sbr.rel (%p2337_p12) target bundleno = 785 (0x311), region = 40 }
  0x53   : > { %1802 = dma.hbm_to_vmem [thread:$0]  (!%p2299_p13), %s2346_s23, 2048, %s2350_s29, %s330_s24, %s3017_s26, %s3017_s26, %s2169_s21  }
  0x54   : > { %s2381_s20 = sand.u32 (!%p2337_p12), 1, %s2157_s28   ;;  %p3018_p6 = scmp.ne.s32.totalorder (!%p2337_p12), %s3008_s16, 0 }
  0x55   : > { %s2384_s15 = sshll.u32 (!%p2337_p12), %s2381_s20, 7  ;;  %s355_s25 = scalar_lea.sflag (!%p2337_p12), [#allocation3], %s2381_s20 }
  0x56   : > { %s2388_s12 = scalar_lea.vmem (!%p2337_p12), [#allocation2], %s2384_s15 }
  0x57   : > { %2132 = dma.done.wait (%p3018_p6), %s355_s25, 2048  }
  0x58   : > { %2134 = vsyncadd (%p3018_p6), %s355_s25, 4294965248  ;;  %s364_s29 = scalar_lea.sflag [#allocation6], %s2381_s20  ;;  %s2396_s21 = scalar_lea.vmem [#allocation5], %s2384_s15 }
  0x59   : > { %2136 = dma.done.wait (%p3018_p6), %s364_s29, 2048  }
  0x5a   : > { %2138 = vsyncadd (%p3018_p6), %s364_s29, 4294965248  ;;  %p433_p13 = scmp.lt.s32.totalorder %s2244_s9, 1  ;;  %v2171_v0 = vmov 0   ;;  %s2772_s29 = scalar_lea.vmem [#allocation11], %s2384_s15 }
  0x5b   : > { %1856 = vset.pattern.permute.xlu1 %v2171_v0  ;;  %1855 = vset.pattern.permute.xlu0 %v2171_v0  ;;  %p3019_p12 = scmp.ne.s32.totalorder %s3009_s17, 0 }
  0x5c   : > { %s2404_s13 = scalar_select %p433_p13, %s2244_s9, 1 }
  0x5e   : > { %s1602_s23 = sshll.u32 %s2404_s13, 7  ;;  %s440_s25 = scalar_lea.vmem %s2987_s1, %s2404_s13 }
  0x5f   : > { %s445_s3 = scalar_lea.vmem %s2988_s2, %s1602_s23  ;;  %s2417_s19 = scalar_lea.vmem %s2986_s0, %s1602_s23  ;;  %v1585_v18 = vld [vmem:[%s440_s25] ss:$0 sm:$0xff] }
  0x60   : > { %v824_v1 = vld [vmem:[%s445_s3 + $0x10] sm:$0xff]  ;;  %v822_v2 = vld [vmem:[%s445_s3] sm:$0xff]  ;;  %v825_v3 = vld [vmem:[%s445_s3 + $0x18] sm:$0xff]  ;;  %s2792_s13 = sshll.u32 %s2244_s9, 11 }
  0x61   : > { %850 = vperm.xlu1 %1856, %v824_v1   ;;  %840 = vperm.xlu0 %1855, %v822_v2   ;;  %v823_v4 = vld [vmem:[%s445_s3 + $0x8] sm:$0xff]  ;;  %v826_v6 = vld [vmem:[%s445_s3 + $0x20] sm:$0xff]  ;;  %v829_v7 = vld [vmem:[%s445_s3 + $0x38] sm:$0xff]  ;;  %s2798_s22 = scalar_lea.hbm %s2992_s6, %s2792_s13 }
  0x62   : > { %v827_v5 = vld [vmem:[%s445_s3 + $0x28] sm:$0xff]  ;;  %v828_v8 = vld [vmem:[%s445_s3 + $0x30] sm:$0xff]  ;;  %v830_v10 = vld [vmem:[%s445_s3 + $0x40] sm:$0xff] }
  0x63   : > { %v831_v9 = vld [vmem:[%s445_s3 + $0x48] sm:$0xff]  ;;  %v833_v11 = vld [vmem:[%s445_s3 + $0x58] sm:$0xff]  ;;  %v832_v12 = vld [vmem:[%s445_s3 + $0x50] sm:$0xff] }
  0x64   : > { %v835_v13 = vld [vmem:[%s445_s3 + $0x68] sm:$0xff]  ;;  %v834_v14 = vld [vmem:[%s445_s3 + $0x60] sm:$0xff]  ;;  %v837_v15 = vld [vmem:[%s445_s3 + $0x78] sm:$0xff] }
  0x65   : > { %855 = vperm.xlu1 %1856, %v825_v3   ;;  %845 = vperm.xlu0 %1855, %v823_v4   ;;  %v836_v16 = vld [vmem:[%s445_s3 + $0x70] sm:$0xff]  ;;  %v446_v17 = vld [vmem:[%s2417_s19] sm:$0xff]  ;;  %v447_v21 = vld [vmem:[%s2417_s19 + $0x8] sm:$0xff] }
  0x66   : > { %v2424_v19 = vadd.f32 %v1585_v18, %v446_v17  ;;  %v448_v20 = vld [vmem:[%s2417_s19 + $0x10] sm:$0xff]  ;;  %v2431_v23 = vadd.f32 %v1585_v18, %v447_v21  ;;  %v449_v24 = vld [vmem:[%s2417_s19 + $0x18] sm:$0xff]  ;;  %v450_v25 = vld [vmem:[%s2417_s19 + $0x20] sm:$0xff] }
  0x67   : > { %v2429_v22 = vadd.f32 %v1585_v18, %v448_v20  ;;  %v2436_v26 = vadd.f32 %v1585_v18, %v449_v24  ;;  %v2439_v27 = vadd.f32 %v1585_v18, %v450_v25  ;;  %v451_v28 = vld [vmem:[%s2417_s19 + $0x28] sm:$0xff]  ;;  %v452_v29 = vld [vmem:[%s2417_s19 + $0x30] sm:$0xff]  ;;  %v453_v32 = vld [vmem:[%s2417_s19 + $0x38] sm:$0xff] }
  0x68   : > { %v2444_v30 = vadd.f32 %v1585_v18, %v451_v28  ;;  %v2447_v31 = vadd.f32 %v1585_v18, %v452_v29  ;;  %v454_v33 = vld [vmem:[%s2417_s19 + $0x40] sm:$0xff]  ;;  %v2452_v34 = vadd.f32 %v1585_v18, %v453_v32  ;;  %v455_v36 = vld [vmem:[%s2417_s19 + $0x48] sm:$0xff]  ;;  %v456_v37 = vld [vmem:[%s2417_s19 + $0x50] sm:$0xff] }
  0x69   : > { %865 = vperm.xlu1 %1856, %v827_v5   ;;  %860 = vperm.xlu0 %1855, %v826_v6   ;;  %v2455_v35 = vadd.f32 %v1585_v18, %v454_v33  ;;  %v2460_v38 = vadd.f32 %v1585_v18, %v455_v36  ;;  %v2463_v39 = vadd.f32 %v1585_v18, %v456_v37  ;;  %v457_v40 = vld [vmem:[%s2417_s19 + $0x58] sm:$0xff]  ;;  %v458_v41 = vld [vmem:[%s2417_s19 + $0x60] sm:$0xff]  ;;  %v459_v44 = vld [vmem:[%s2417_s19 + $0x68] sm:$0xff] }
  0x6a   : > { %v2468_v42 = vadd.f32 %v1585_v18, %v457_v40  ;;  %v2471_v43 = vadd.f32 %v1585_v18, %v458_v41  ;;  %v460_v45 = vld [vmem:[%s2417_s19 + $0x70] sm:$0xff]  ;;  %v2476_v46 = vadd.f32 %v1585_v18, %v459_v44  ;;  %v461_v48 = vld [vmem:[%s2417_s19 + $0x78] sm:$0xff] }
  0x6b   : > { %v2479_v47 = vadd.f32 %v1585_v18, %v460_v45  ;;  %v2483_v49 = vadd.f32 %v1585_v18, %v461_v48 }
  0x6d   : > { %875 = vperm.xlu1 %1856, %v829_v7   ;;  %870 = vperm.xlu0 %1855, %v828_v8  }
  0x71   : > { %885 = vperm.xlu1 %1856, %v831_v9   ;;  %880 = vperm.xlu0 %1855, %v830_v10  }
  0x75   : > { %895 = vperm.xlu1 %1856, %v833_v11   ;;  %890 = vperm.xlu0 %1855, %v832_v12  }
  0x79   : > { %905 = vperm.xlu1 %1856, %v835_v13   ;;  %900 = vperm.xlu0 %1855, %v834_v14  }
  0x7d   : > { %915 = vperm.xlu1 %1856, %v837_v15   ;;  %910 = vperm.xlu0 %1855, %v836_v16  }
  0x9c   : > { %485 = vmax.xlane.f32.xlu0 %v2424_v19 }
  0xa0   : > { %489 = vmax.xlane.f32.xlu0 %v2429_v22 }
  0xa1   : > { %487 = vmax.xlane.f32.xlu1 %v2431_v23 }
  0xa4   : > { %491 = vmax.xlane.f32.xlu0 %v2436_v26 }
  0xa5   : > { %493 = vmax.xlane.f32.xlu1 %v2439_v27 }
  0xa8   : > { %495 = vmax.xlane.f32.xlu0 %v2444_v30 }
  0xa9   : > { %497 = vmax.xlane.f32.xlu1 %v2447_v31 }
  0xac   : > { %499 = vmax.xlane.f32.xlu0 %v2452_v34 }
  0xad   : > { %501 = vmax.xlane.f32.xlu1 %v2455_v35 }
  0xb0   : > { %503 = vmax.xlane.f32.xlu0 %v2460_v38 }
  0xb1   : > { %505 = vmax.xlane.f32.xlu1 %v2463_v39 }
  0xb4   : > { %507 = vmax.xlane.f32.xlu0 %v2468_v42 }
  0xb5   : > { %509 = vmax.xlane.f32.xlu1 %v2471_v43 }
  0xb8   : > { %511 = vmax.xlane.f32.xlu0 %v2476_v46 }
  0xb9   : > { %513 = vmax.xlane.f32.xlu1 %v2479_v47 }
  0xbc   : > { %515 = vmax.xlane.f32.xlu0 %v2483_v49 }
  0xdc   : > { %v851_v50 = vpop.permute.xlu1 %850  ;;  %v841_v51 = vpop.permute.xlu0 %840 }
  0xdd   : > { %v918_v2 = vadd.f32 %v841_v51, %v2424_v19  ;;  %v920_v6 = vadd.f32 %v851_v50, %v2429_v22 }
  0xe0   : > { %v856_v52 = vpop.permute.xlu1 %855  ;;  %v846_v53 = vpop.permute.xlu0 %845 }
  0xe1   : > { %v919_v3 = vadd.f32 %v846_v53, %v2431_v23  ;;  %v921_v7 = vadd.f32 %v856_v52, %v2436_v26 }
  0xe4   : > { %v866_v54 = vpop.permute.xlu1 %865  ;;  %v861_v55 = vpop.permute.xlu0 %860 }
  0xe5   : > { %v923_v62 = vadd.f32 %v866_v54, %v2444_v30  ;;  %v922_v63 = vadd.f32 %v861_v55, %v2439_v27 }
  0xe7   : > { %v935_v12 = vmax.f32 %v919_v3, %v923_v62  ;;  %v934_v13 = vmax.f32 %v918_v2, %v922_v63 }
  0xe8   : > { %v876_v56 = vpop.permute.xlu1 %875  ;;  %v871_v57 = vpop.permute.xlu0 %870 }
  0xe9   : > { %v925_v0 = vadd.f32 %v876_v56, %v2452_v34  ;;  %v924_v1 = vadd.f32 %v871_v57, %v2447_v31 }
  0xeb   : > { %v937_v16 = vmax.f32 %v921_v7, %v925_v0  ;;  %v936_v17 = vmax.f32 %v920_v6, %v924_v1 }
  0xec   : > { %v886_v58 = vpop.permute.xlu1 %885  ;;  %v881_v59 = vpop.permute.xlu0 %880 }
  0xed   : > { %v2494_v4 = vadd.f32 %v886_v58, %v2460_v38  ;;  %v926_v5 = vadd.f32 %v881_v59, %v2455_v35 }
  0xef   : > { %v939_v18 = vmax.f32 %v935_v12, %v2494_v4  ;;  %v938_v20 = vmax.f32 %v934_v13, %v926_v5 }
  0xf0   : > { %v896_v60 = vpop.permute.xlu1 %895  ;;  %v891_v61 = vpop.permute.xlu0 %890 }
  0xf1   : > { %v2500_v8 = vadd.f32 %v896_v60, %v2468_v42  ;;  %v2503_v9 = vadd.f32 %v891_v61, %v2463_v39 }
  0xf3   : > { %v941_v21 = vmax.f32 %v937_v16, %v2500_v8  ;;  %v940_v24 = vmax.f32 %v936_v17, %v2503_v9 }
  0xf4   : > { %v906_v10 = vpop.permute.xlu1 %905  ;;  %v901_v11 = vpop.permute.xlu0 %900 }
  0xf5   : > { %v2506_v14 = vadd.f32 %v906_v10, %v2476_v46  ;;  %v2509_v15 = vadd.f32 %v901_v11, %v2471_v43 }
  0xf7   : > { %v943_v29 = vmax.f32 %v939_v18, %v2506_v14  ;;  %v942_v32 = vmax.f32 %v938_v20, %v2509_v15 }
  0xf8   : > { %v916_v25 = vpop.permute.xlu1 %915  ;;  %v911_v28 = vpop.permute.xlu0 %910 }
  0xf9   : > { %v2517_v33 = vadd.f32 %v916_v25, %v2483_v49  ;;  %v2520_v36 = vadd.f32 %v911_v28, %v2479_v47  ;;  %v946_v41 = vmax.f32 %v942_v32, %v943_v29 }
  0xfb   : > { %v945_v37 = vmax.f32 %v941_v21, %v2517_v33  ;;  %v944_v40 = vmax.f32 %v940_v24, %v2520_v36 }
  0xfd   : > { %v947_v44 = vmax.f32 %v944_v40, %v945_v37 }
  0xff   : > { %v948_v45 = vmax.f32 %v946_v41, %v947_v44 }
 0x101   : > { %v949_v48 = vrot.slane %v948_v45, 4 }
 0x103   : > { %v950_v50 = vmax.f32 %v948_v45, %v949_v48 }
 0x105   : > { %v951_v51 = vrot.slane %v950_v50, 2 }
 0x107   : > { %v952_v52 = vmax.f32 %v950_v50, %v951_v51 }
 0x109   : > { %v953_v53 = vrot.slane %v952_v52, 1 }
 0x10b   : > { %v2524_v54 = vmax.f32 %v952_v52, %v953_v53 }
 0x10d   : > { %v955_v55 = vsub.f32 %v918_v2, %v2524_v54  ;;  %v956_v56 = vsub.f32 %v919_v3, %v2524_v54  ;;  %v957_v57 = vsub.f32 %v920_v6, %v2524_v54  ;;  %v958_v58 = vsub.f32 %v921_v7, %v2524_v54 }
 0x10e   : > { %v959_v61 = vsub.f32 %v922_v63, %v2524_v54  ;;  %v960_v11 = vsub.f32 %v923_v62, %v2524_v54  ;;  %v961_v13 = vsub.f32 %v924_v1, %v2524_v54  ;;  %v962_v3 = vsub.f32 %v925_v0, %v2524_v54 }
 0x10f   : > { %v971_v59 = vmul.f32 1.442695, %v955_v55  ;;  %v973_v60 = vmul.f32 1.442695, %v956_v56  ;;  %v975_v10 = vmul.f32 1.442695, %v957_v57  ;;  %v963_v7 = vsub.f32 %v926_v5, %v2524_v54 }
 0x110   : > { %v977_v12 = vmul.f32 1.442695, %v958_v58  ;;  %v979_v2 = vmul.f32 1.442695, %v959_v61  ;;  %v981_v6 = vmul.f32 1.442695, %v960_v11  ;;  %v964_v63 = vsub.f32 %v2494_v4, %v2524_v54 }
 0x111   : > { %1857 = vpow2.f32 %v971_v59  ;;  %v983_v16 = vmul.f32 1.442695, %v961_v13  ;;  %v985_v17 = vmul.f32 1.442695, %v962_v3  ;;  %v965_v62 = vsub.f32 %v2503_v9, %v2524_v54 }
 0x112   : > { %1859 = vpow2.f32 %v973_v60  ;;  %v987_v1 = vmul.f32 1.442695, %v963_v7  ;;  %v966_v0 = vsub.f32 %v2500_v8, %v2524_v54  ;;  %v989_v20 = vmul.f32 1.442695, %v964_v63 }
 0x113   : > { %1861 = vpow2.f32 %v975_v10  ;;  %v967_v21 = vsub.f32 %v2509_v15, %v2524_v54  ;;  %v991_v4 = vmul.f32 1.442695, %v965_v62  ;;  %v968_v25 = vsub.f32 %v2506_v14, %v2524_v54 }
 0x114   : > { %1863 = vpow2.f32 %v977_v12  ;;  %v993_v28 = vmul.f32 1.442695, %v966_v0  ;;  %v969_v32 = vsub.f32 %v2520_v36, %v2524_v54  ;;  %v970_v14 = vsub.f32 %v2517_v33, %v2524_v54  ;;  %v660_v0 = vld [vmem:[%s2388_s12 + $0x78] sm:$0xff] }
 0x115   : > { %1865 = vpow2.f32 %v979_v2  ;;  %v995_v15 = vmul.f32 1.442695, %v967_v21  ;;  %v997_v45 = vmul.f32 1.442695, %v968_v25  ;;  %1672 = vmatprep.subr.mxu0 %v660_v0 }
 0x116   : > { %1867 = vpow2.f32 %v981_v6  ;;  %v999_v36 = vmul.f32 1.442695, %v969_v32  ;;  %v1001_v54 = vmul.f32 1.442695, %v970_v14  ;;  %1673 = vmatpush3.msra.mxu0 %v660_v0 }
 0x117   : > { %1869 = vpow2.f32 %v983_v16 }
 0x118   : > { %1871 = vpow2.f32 %v985_v17 }
 0x119   : > { %1873 = vpow2.f32 %v987_v1 }
 0x11a   : > { %1875 = vpow2.f32 %v989_v20 }
 0x11b   : > { %1877 = vpow2.f32 %v991_v4 }
 0x11c   : > { %1879 = vpow2.f32 %v993_v28 }
 0x11d   : > { %1881 = vpow2.f32 %v995_v15 }
 0x11e   : > { %v2539_v18 = vpop.eup %1857 }
 0x11f   : > { %v2543_v5 = vpop.eup %1859 }
 0x120   : > { %v1003_v24 = vadd.f32 %v2543_v5, %v2539_v18  ;;  %v2549_v9 = vpop.eup %1861 }
 0x121   : > { %v2554_v29 = vpop.eup %1863 }
 0x122   : > { %v1004_v8 = vadd.f32 %v2549_v9, %v1003_v24  ;;  %v2560_v44 = vpop.eup %1865 }
 0x123   : > { %v2565_v51 = vpop.eup %1867 }
 0x124   : > { %v1005_v40 = vadd.f32 %v2554_v29, %v1004_v8  ;;  %v2569_v56 = vpop.eup %1869 }
 0x125   : > { %v486_v37 = vpop.xlane.xlu0 %485  ;;  %v2573_v59 = vpop.eup %1871 }
 0x126   : > { %v517_v41 = vsub.f32 %v2424_v19, %v486_v37  ;;  %v1006_v48 = vadd.f32 %v2560_v44, %v1005_v40  ;;  %v2577_v12 = vpop.eup %1873  ;;  %v659_v37 = vld [vmem:[%s2388_s12 + $0x70] sm:$0xff]  ;;  %v658_v40 = vld [vmem:[%s2388_s12 + $0x68] sm:$0xff] }
 0x127   : > { %v2581_v3 = vpop.eup %1875  ;;  %1674 = vmatprep.subr.mxu0 %v659_v37 }
 0x128   : > { %v533_v50 = vmul.f32 1.442695, %v517_v41  ;;  %v1007_v53 = vadd.f32 %v2565_v51, %v1006_v48  ;;  %v2585_v17 = vpop.eup %1877  ;;  %1675 = vmatpush3.msra.mxu0 %v659_v37  ;;  %v651_v37 = vld [vmem:[%s2388_s12 + $0x30] sm:$0xff] }
 0x129   : > { %v490_v52 = vpop.xlane.xlu0 %489  ;;  %v2590_v20 = vpop.eup %1879  ;;  %1676 = vmatprep.subr.mxu0 %v658_v40 }
 0x12a   : > { %1883 = vpow2.f32 %v533_v50  ;;  %v519_v19 = vsub.f32 %v2429_v22, %v490_v52  ;;  %v488_v55 = vpop.xlane.xlu1 %487  ;;  %v1008_v57 = vadd.f32 %v2569_v56, %v1007_v53  ;;  %v2592_v24 = vpop.eup %1881  ;;  %1677 = vmatpush3.msra.mxu0 %v658_v40 }
 0x12b   : > { %v518_v33 = vsub.f32 %v2431_v23, %v488_v55  ;;  %1885 = vpow2.f32 %v997_v45 }
 0x12c   : > { %v537_v58 = vmul.f32 1.442695, %v519_v19  ;;  %1887 = vpow2.f32 %v999_v36  ;;  %v1009_v10 = vadd.f32 %v2573_v59, %v1008_v57 }
 0x12d   : > { %v535_v60 = vmul.f32 1.442695, %v518_v33  ;;  %v492_v61 = vpop.xlane.xlu0 %491  ;;  %v657_v33 = vld [vmem:[%s2388_s12 + $0x60] sm:$0xff] }
 0x12e   : > { %1889 = vpow2.f32 %v537_v58  ;;  %v494_v11 = vpop.xlane.xlu1 %493  ;;  %v520_v22 = vsub.f32 %v2436_v26, %v492_v61  ;;  %v1010_v13 = vadd.f32 %v2577_v12, %v1009_v10  ;;  %1678 = vmatprep.subr.mxu0 %v657_v33 }
 0x12f   : > { %1891 = vpow2.f32 %v535_v60  ;;  %v521_v23 = vsub.f32 %v2439_v27, %v494_v11  ;;  %1679 = vmatpush3.msra.mxu0 %v657_v33  ;;  %v647_v33 = vld [vmem:[%s2388_s12 + $0x10] sm:$0xff] }
 0x130   : > { %1893 = vpow2.f32 %v1001_v54  ;;  %v539_v2 = vmul.f32 1.442695, %v520_v22  ;;  %v1011_v16 = vadd.f32 %v2581_v3, %v1010_v13  ;;  %v656_v54 = vld [vmem:[%s2388_s12 + $0x58] sm:$0xff] }
 0x131   : > { %v541_v6 = vmul.f32 1.442695, %v521_v23  ;;  %v496_v7 = vpop.xlane.xlu0 %495  ;;  %1680 = vmatprep.subr.mxu0 %v656_v54 }
 0x132   : > { %1895 = vpow2.f32 %v539_v2  ;;  %v498_v63 = vpop.xlane.xlu1 %497  ;;  %v522_v26 = vsub.f32 %v2444_v30, %v496_v7  ;;  %v1012_v62 = vadd.f32 %v2585_v17, %v1011_v16  ;;  %1681 = vmatpush3.msra.mxu0 %v656_v54  ;;  %v655_v2 = vld [vmem:[%s2388_s12 + $0x50] sm:$0xff]  ;;  %v646_v54 = vld [vmem:[%s2388_s12 + $0x8] sm:$0xff] }
 0x133   : > { %1897 = vpow2.f32 %v541_v6  ;;  %v523_v27 = vsub.f32 %v2447_v31, %v498_v63  ;;  %1682 = vmatprep.subr.mxu0 %v655_v2  ;;  %v654_v63 = vld [vmem:[%s2388_s12 + $0x48] sm:$0xff] }
 0x134   : > { %v543_v1 = vmul.f32 1.442695, %v522_v26  ;;  %v1013_v30 = vadd.f32 %v2590_v20, %v1012_v62  ;;  %1683 = vmatpush3.msra.mxu0 %v655_v2  ;;  %v1054_v2 = vld [vmem:[%s2396_s21 + $0x68] sm:$0xff] }
 0x135   : > { %v545_v21 = vmul.f32 1.442695, %v523_v27  ;;  %v500_v4 = vpop.xlane.xlu0 %499  ;;  %1684 = vmatprep.subr.mxu0 %v654_v63 }
 0x136   : > { %1899 = vpow2.f32 %v543_v1  ;;  %v502_v25 = vpop.xlane.xlu1 %501  ;;  %v524_v28 = vsub.f32 %v2452_v34, %v500_v4  ;;  %v1014_v32 = vadd.f32 %v2592_v24, %v1013_v30  ;;  %1685 = vmatpush3.msra.mxu0 %v654_v63  ;;  %v1045_v63 = vld [vmem:[%s2396_s21 + $0x20] sm:$0xff] }
 0x137   : > { %v2596_v31 = vpop.eup %1883  ;;  %1901 = vpow2.f32 %v545_v21  ;;  %v525_v8 = vsub.f32 %v2455_v35, %v502_v25  ;;  %v653_v21 = vld [vmem:[%s2388_s12 + $0x40] sm:$0xff] }
 0x138   : > { %v547_v15 = vmul.f32 1.442695, %v524_v28  ;;  %565 = vadd.xlane.f32.xlu1 %v2596_v31  ;;  %v2603_v41 = vpop.eup %1885  ;;  %1686 = vmatprep.subr.mxu0 %v653_v21  ;;  %v652_v28 = vld [vmem:[%s2388_s12 + $0x38] sm:$0xff] }
 0x139   : > { %v549_v14 = vmul.f32 1.442695, %v525_v8  ;;  %v504_v45 = vpop.xlane.xlu0 %503  ;;  %v2605_v34 = vpop.eup %1887  ;;  %v1015_v48 = vadd.f32 %v2603_v41, %v1014_v32  ;;  %1687 = vmatpush3.msra.mxu0 %v653_v21 }
 0x13a   : > { %1903 = vpow2.f32 %v547_v15  ;;  %v506_v35 = vpop.xlane.xlu1 %505  ;;  %v526_v50 = vsub.f32 %v2460_v38, %v504_v45  ;;  %1688 = vmatprep.subr.mxu0 %v652_v28  ;;  %v650_v45 = vld [vmem:[%s2388_s12 + $0x28] sm:$0xff] }
 0x13b   : > { %v2609_v36 = vpop.eup %1889  ;;  %1905 = vpow2.f32 %v549_v14  ;;  %v527_v52 = vsub.f32 %v2463_v39, %v506_v35  ;;  %v1016_v19 = vadd.f32 %v2605_v34, %v1015_v48  ;;  %1689 = vmatpush3.msra.mxu0 %v652_v28  ;;  %v649_v35 = vld [vmem:[%s2388_s12 + $0x20] sm:$0xff] }
 0x13c   : > { %v2612_v53 = vpop.eup %1891  ;;  %v551_v55 = vmul.f32 1.442695, %v526_v50  ;;  %569 = vadd.xlane.f32.xlu1 %v2609_v36  ;;  %1690 = vmatprep.subr.mxu0 %v651_v37 }
 0x13d   : > { %v2618_v57 = vpop.eup %1893  ;;  %v553_v38 = vmul.f32 1.442695, %v527_v52  ;;  %567 = vadd.xlane.f32.xlu0 %v2612_v53  ;;  %v508_v58 = vpop.xlane.xlu0 %507  ;;  %1691 = vmatpush3.msra.mxu0 %v651_v37  ;;  %v648_v52 = vld [vmem:[%s2388_s12 + $0x18] sm:$0xff] }
 0x13e   : > { %v1017_v39 = vadd.f32 %v2618_v57, %v1016_v19  ;;  %1907 = vpow2.f32 %v551_v55  ;;  %v510_v60 = vpop.xlane.xlu1 %509  ;;  %v528_v61 = vsub.f32 %v2468_v42, %v508_v58  ;;  %1692 = vmatprep.subr.mxu0 %v650_v45  ;;  %v645_v58 = vld [vmem:[%s2388_s12] sm:$0xff]  ;;  %s2738_s12 = scalar_lea.vmem [#allocation8], %s2384_s15 }
 0x13f   : > { %v2623_v10 = vpop.eup %1895  ;;  %1909 = vpow2.f32 %v553_v38  ;;  %v529_v11 = vsub.f32 %v2471_v43, %v510_v60  ;;  %1693 = vmatpush3.msra.mxu0 %v650_v45  ;;  %s1311_s3 = sshll.u32 %s2738_s12, 4  ;;  %s2801_s3 = int_to_ptr.vmem [resolvable:$true] %s1311_s3 }
 0x140   : > { %v2626_v22 = vpop.eup %1897  ;;  %v1018_v23 = vrot.slane %v1017_v39, 4  ;;  %v555_v13 = vmul.f32 1.442695, %v528_v61  ;;  %1694 = vmatprep.subr.mxu0 %v649_v35  ;;  %s2011_s14 = scalar_lea.vmem %s2801_s3, 2048 }
 0x141   : > { %v557_v6 = vmul.f32 1.442695, %v529_v11  ;;  %573 = vadd.xlane.f32.xlu1 %v2626_v22  ;;  %571 = vadd.xlane.f32.xlu0 %v2623_v10  ;;  %v512_v42 = vpop.xlane.xlu0 %511  ;;  %p2012_p1 = scmp.ne.s32.totalorder %s2801_s3, %s2011_s14 }
 0x142   : > { %v1019_v7 = vadd.f32 %v1018_v23, %v1017_v39  ;;  %1911 = vpow2.f32 %v555_v13  ;;  %v514_v16 = vpop.xlane.xlu1 %513  ;;  %v530_v43 = vsub.f32 %v2476_v46, %v512_v42  ;;  %1695 = vmatpush3.msra.mxu0 %v649_v35  ;;  %v1056_v23 = vld [vmem:[%s2396_s21 + $0x78] sm:$0xff]  ;;  %v1055_v13 = vld [vmem:[%s2396_s21 + $0x70] sm:$0xff]  ;;  %v1049_v42 = vld [vmem:[%s2396_s21 + $0x40] sm:$0xff] }
 0x143   : > { %v2633_v26 = vpop.eup %1899  ;;  %1913 = vpow2.f32 %v557_v6  ;;  %v531_v27 = vsub.f32 %v2479_v47, %v514_v16  ;;  %1696 = vmatprep.subr.mxu0 %v648_v52  ;;  %1728 = vmatprep.subr.mxu1 %v1056_v23  ;;  %v1050_v6 = vld [vmem:[%s2396_s21 + $0x48] sm:$0xff]  ;;  %v1047_v16 = vld [vmem:[%s2396_s21 + $0x30] sm:$0xff]  ;;  %p2013_p7 = pnand %p2012_p1, %p3019_p12 }
 0x144   : > { %v2636_v62 = vpop.eup %1901  ;;  %v1020_v1 = vrot.slane %v1019_v7, 2  ;;  %v559_v0 = vmul.f32 1.442695, %v530_v43  ;;  %1697 = vmatpush3.msra.mxu0 %v648_v52  ;;  %1729 = vmatpush3.msra.mxu1 %v1056_v23  ;;  %v1046_v43 = vld [vmem:[%s2396_s21 + $0x28] sm:$0xff] }
 0x145   : > { %v561_v4 = vmul.f32 1.442695, %v531_v27  ;;  %577 = vadd.xlane.f32.xlu1 %v2636_v62  ;;  %575 = vadd.xlane.f32.xlu0 %v2633_v26  ;;  %v516_v46 = vpop.xlane.xlu0 %515  ;;  %v1044_v27 = vld [vmem:[%s2396_s21 + $0x18] sm:$0xff]  ;;  %p2014_p10 = pneg %p2013_p7 }
 0x146   : > { %v1021_v30 = vadd.f32 %v1020_v1, %v1019_v7  ;;  %1915 = vpow2.f32 %v559_v0  ;;  %v532_v25 = vsub.f32 %v2483_v49, %v516_v46  ;;  %1698 = vmatprep.subr.mxu0 %v647_v33  ;;  %1730 = vmatprep.subr.mxu1 %v1055_v13  ;;  %v1048_v7 = vld [vmem:[%s2396_s21 + $0x38] sm:$0xff]  ;;  %v1043_v1 = vld [vmem:[%s2396_s21 + $0x10] sm:$0xff]  ;;  %v1042_v0 = vld [vmem:[%s2396_s21 + $0x8] sm:$0xff] }
 0x147   : > { %v2642_v47 = vpop.eup %1903  ;;  %1917 = vpow2.f32 %v561_v4  ;;  %1699 = vmatpush3.msra.mxu0 %v647_v33  ;;  %1731 = vmatpush3.msra.mxu1 %v1055_v13  ;;  %v1041_v4 = vld [vmem:[%s2396_s21] sm:$0xff] }
 0x148   : > { %v2645_v8 = vpop.eup %1905  ;;  %v1022_v32 = vrot.slane %v1021_v30, 1  ;;  %v563_v15 = vmul.f32 1.442695, %v532_v25  ;;  %1700 = vmatprep.subr.mxu0 %v646_v54  ;;  %1732 = vmatprep.subr.mxu1 %v1054_v2 }
 0x149   : > { %581 = vadd.xlane.f32.xlu1 %v2645_v8  ;;  %579 = vadd.xlane.f32.xlu0 %v2642_v47 }
 0x14a   : > { %v1023_v40 = vadd.f32 %v1022_v32, %v1021_v30  ;;  %1919 = vpow2.f32 %v563_v15  ;;  %1701 = vmatpush3.msra.mxu0 %v646_v54  ;;  %1733 = vmatpush3.msra.mxu1 %v1054_v2 }
 0x14b   : > { %v2650_v49 = vpop.eup %1907  ;;  %1702 = vmatprep.subr.mxu0 %v645_v58 }
 0x14c   : > { %v2652_v14 = vpop.eup %1909  ;;  %1921 = vrcp.f32 %v1023_v40  ;;  %1703 = vmatpush3.msra.mxu0 %v645_v58 }
 0x14d   : > { %585 = vadd.xlane.f32.xlu1 %v2652_v14  ;;  %583 = vadd.xlane.f32.xlu0 %v2650_v49 }
 0x14f   : > { %v2657_v48 = vpop.eup %1911 }
 0x150   : > { %v2660_v50 = vpop.eup %1913 }
 0x151   : > { %589 = vadd.xlane.f32.xlu1 %v2660_v50  ;;  %587 = vadd.xlane.f32.xlu0 %v2657_v48 }
 0x153   : > { %v2665_v19 = vpop.eup %1915 }
 0x154   : > { %v2667_v55 = vpop.eup %1917 }
 0x155   : > { %593 = vadd.xlane.f32.xlu1 %v2667_v55  ;;  %591 = vadd.xlane.f32.xlu0 %v2665_v19 }
 0x157   : > { %v2673_v38 = vpop.eup %1919 }
 0x159   : > { %595 = vadd.xlane.f32.xlu0 %v2673_v38  ;;  %v2677_v39 = vpop.eup %1921 }
 0x15a   : > { %v2681_v60 = vmul.f32 %v2677_v39, %v2603_v41  ;;  %v2685_v61 = vmul.f32 %v2677_v39, %v2605_v34  ;;  %v2689_v11 = vmul.f32 %v2677_v39, %v2618_v57  ;;  %v1053_v41 = vld [vmem:[%s2396_s21 + $0x60] sm:$0xff]  ;;  %v1052_v34 = vld [vmem:[%s2396_s21 + $0x58] sm:$0xff]  ;;  %v1051_v57 = vld [vmem:[%s2396_s21 + $0x50] sm:$0xff]  ;;  %v1025_v21 = vmul.f32 %v2677_v39, %v2539_v18  ;;  %s1271_s21 = sand.u32 1, %s2244_s9   ;;  %s2172_s9 = smov [#allocation8]  }
 0x15b   : > { %1734 = vmatprep.subr.mxu1 %v1053_v41  ;;  %v1026_v46 = vmul.f32 %v2677_v39, %v2543_v5  ;;  %v1027_v30 = vmul.f32 %v2677_v39, %v2549_v9  ;;  %v1028_v25 = vmul.f32 %v2677_v39, %v2554_v29  ;;  %v1029_v18 = vmul.f32 %v2677_v39, %v2560_v44  ;;  %s2803_s16 = scalar_lea.sflag [#allocation9], %s1271_s21  ;;  %s2015_s19 = sshll.u32 %s2172_s9, 4  ;;  %s2016_s19 = int_to_ptr.vmem [resolvable:$false] %s2015_s19 }
 0x15c   : > { %1735 = vmatpush3.msra.mxu1 %v1053_v41  ;;  %v1030_v28 = vmul.f32 %v2677_v39, %v2565_v51  ;;  %v1031_v5 = vmul.f32 %v2677_v39, %v2569_v56  ;;  %v1032_v9 = vmul.f32 %v2677_v39, %v2573_v59  ;;  %v1033_v29 = vmul.f32 %v2677_v39, %v2577_v12  ;;  %s2017_s10 = scalar_lea.vmem %s2016_s19, 4096  ;;  %p2018_p0 = scmp.lt.s32.totalorder %s2801_s3, %s2016_s19 }
 0x15d   : > { %1736 = vmatprep.subr.mxu1 %v1052_v34  ;;  %v1034_v44 = vmul.f32 %v2677_v39, %v2581_v3  ;;  %v1035_v51 = vmul.f32 %v2677_v39, %v2585_v17  ;;  %v1036_v56 = vmul.f32 %v2677_v39, %v2590_v20  ;;  %v1037_v59 = vmul.f32 %v2677_v39, %v2592_v24  ;;  %p2019_p2 = scmp.lt.s32.totalorder %s2017_s10, %s2011_s14 }
 0x15e   : > { %1737 = vmatpush3.msra.mxu1 %v1052_v34 }
 0x15f   : > { %1738 = vmatprep.subr.mxu1 %v1051_v57  ;;  %p2020_p4 = por %p2019_p2, %p2018_p0 }
 0x160   : > { %1739 = vmatpush3.msra.mxu1 %v1051_v57 }
 0x161   : > { %1740 = vmatprep.subr.mxu1 %v1050_v6  ;;  %p2021_p9 = pnand %p2020_p4, %p2014_p10 }
 0x162   : > { %1741 = vmatpush3.msra.mxu1 %v1050_v6 }
 0x163   : > { %1742 = vmatprep.subr.mxu1 %v1049_v42 }
 0x164   : > { %1743 = vmatpush3.msra.mxu1 %v1049_v42 }
 0x165   : > { %1744 = vmatprep.subr.mxu1 %v1048_v7 }
 0x166   : > { %1745 = vmatpush3.msra.mxu1 %v1048_v7 }
 0x167   : > { %1746 = vmatprep.subr.mxu1 %v1047_v16 }
 0x168   : > { %1747 = vmatpush3.msra.mxu1 %v1047_v16 }
 0x169   : > { %1748 = vmatprep.subr.mxu1 %v1046_v43 }
 0x16a   : > { %1749 = vmatpush3.msra.mxu1 %v1046_v43 }
 0x16b   : > { %1750 = vmatprep.subr.mxu1 %v1045_v63 }
 0x16c   : > { %1751 = vmatpush3.msra.mxu1 %v1045_v63 }
 0x16d   : > { %1752 = vmatprep.subr.mxu1 %v1044_v27 }
 0x16e   : > { %1753 = vmatpush3.msra.mxu1 %v1044_v27 }
 0x16f   : > { %1754 = vmatprep.subr.mxu1 %v1043_v1 }
 0x170   : > { %1755 = vmatpush3.msra.mxu1 %v1043_v1 }
 0x171   : > { %1756 = vmatprep.subr.mxu1 %v1042_v0 }
 0x172   : > { %1757 = vmatpush3.msra.mxu1 %v1042_v0 }
 0x173   : > { %1758 = vmatprep.subr.mxu1 %v1041_v4 }
 0x174   : > { %1759 = vmatpush3.msra.mxu1 %v1041_v4 }
 0x188   : > { %1057 = vxpose.xlu1.b32.start [1/16] %v1025_v21, 128 }
 0x18c   : > { %1058 = vxpose.xlu1.b32.cont [2/16] %v1026_v46, 128 }
 0x190   : > { %1059 = vxpose.xlu1.b32.cont [3/16] %v1027_v30, 128 }
 0x194   : > { %1060 = vxpose.xlu1.b32.cont [4/16] %v1028_v25, 128 }
 0x198   : > { %1061 = vxpose.xlu1.b32.cont [5/16] %v1029_v18, 128 }
 0x19c   : > { %1062 = vxpose.xlu1.b32.cont [6/16] %v1030_v28, 128 }
 0x1a0   : > { %1063 = vxpose.xlu1.b32.cont [7/16] %v1031_v5, 128 }
 0x1a4   : > { %1064 = vxpose.xlu1.b32.cont [8/16] %v1032_v9, 128 }
 0x1a8   : > { %1065 = vxpose.xlu1.b32.cont [9/16] %v1033_v29, 128 }
 0x1ac   : > { %1066 = vxpose.xlu1.b32.cont [10/16] %v1034_v44, 128 }
 0x1b0   : > { %1067 = vxpose.xlu1.b32.cont [11/16] %v1035_v51, 128 }
 0x1b4   : > { %1068 = vxpose.xlu1.b32.cont [12/16] %v1036_v56, 128 }
 0x1b8   : > { %1069 = vxpose.xlu1.b32.cont [13/16] %v1037_v59, 128 }
 0x1bc   : > { %1070 = vxpose.xlu1.b32.cont [14/16] %v2681_v60, 128 }
 0x1c0   : > { %1071 = vxpose.xlu1.b32.cont [15/16] %v2685_v61, 128 }
 0x1c1   : > { %v566_v12 = vpop.xlane.xlu1 %565 }
 0x1c2   : > { %1923 = vrcp.f32 %v566_v12 }
 0x1c4   : > { %1072 = vxpose.xlu1.b32.end [16/16] %v2689_v11, 128 }
 0x1c5   : > { %v570_v3 = vpop.xlane.xlu1 %569 }
 0x1c6   : > { %1925 = vrcp.f32 %v570_v3  ;;  %v568_v17 = vpop.xlane.xlu0 %567 }
 0x1c7   : > { %1927 = vrcp.f32 %v568_v17 }
 0x1ca   : > { %v574_v32 = vpop.xlane.xlu1 %573  ;;  %v572_v20 = vpop.xlane.xlu0 %571 }
 0x1cb   : > { %1929 = vrcp.f32 %v574_v32 }
 0x1cc   : > { %1931 = vrcp.f32 %v572_v20 }
 0x1ce   : > { %v578_v15 = vpop.xlane.xlu1 %577  ;;  %v576_v24 = vpop.xlane.xlu0 %575 }
 0x1cf   : > { %v1924_v37 = vpop.eup %1923  ;;  %1933 = vrcp.f32 %v578_v15 }
 0x1d0   : > { %1935 = vrcp.f32 %v576_v24  ;;  %v613_v40 = vmul.f32 %v1924_v37, %v2596_v31 }
 0x1d2   : > { %629 = vst [vmem:[%s2738_s12] sm:$0xff] %v613_v40  ;;  %1704 = vmatprep.mubr.f32.mxu0 %v613_v40  ;;  %v582_v45 = vpop.xlane.xlu1 %581  ;;  %v580_v35 = vpop.xlane.xlu0 %579 }
 0x1d3   : > { %v1926_v52 = vpop.eup %1925  ;;  %1937 = vrcp.f32 %v582_v45 }
 0x1d4   : > { %v1928_v33 = vpop.eup %1927  ;;  %1939 = vrcp.f32 %v580_v35  ;;  %v615_v54 = vmul.f32 %v1926_v52, %v2609_v36 }
 0x1d5   : > { %v614_v58 = vmul.f32 %v1928_v33, %v2612_v53 }
 0x1d6   : > { %v586_v39 = vpop.xlane.xlu1 %585  ;;  %v584_v31 = vpop.xlane.xlu0 %583  ;;  %631 = vst [vmem:[%s2738_s12 + $0x10] sm:$0xff] %v615_v54 }
 0x1d7   : > { %1941 = vrcp.f32 %v586_v39  ;;  %630 = vst [vmem:[%s2738_s12 + $0x8] sm:$0xff] %v614_v58  ;;  %1705 = vmatmul.mubr.f32.vlgmr.msra.gmra.mxu0 %v614_v58 }
 0x1d8   : > { %v1930_v60 = vpop.eup %1929  ;;  %1943 = vrcp.f32 %v584_v31  ;;  %1707 = vmatprep.mubr.f32.mxu0 %v615_v54 }
 0x1d9   : > { %v1932_v61 = vpop.eup %1931  ;;  %v617_v11 = vmul.f32 %v1930_v60, %v2626_v22 }
 0x1da   : > { %v590_v23 = vpop.xlane.xlu1 %589  ;;  %v588_v13 = vpop.xlane.xlu0 %587  ;;  %v616_v36 = vmul.f32 %v1932_v61, %v2623_v10 }
 0x1db   : > { %1945 = vrcp.f32 %v590_v23  ;;  %633 = vst [vmem:[%s2738_s12 + $0x20] sm:$0xff] %v617_v11 }
 0x1dc   : > { %v1934_v53 = vpop.eup %1933  ;;  %1947 = vrcp.f32 %v588_v13  ;;  %632 = vst [vmem:[%s2738_s12 + $0x18] sm:$0xff] %v616_v36  ;;  %1708 = vmatmul.mubr.f32.gmra.mxu0 %v616_v36 }
 0x1dd   : > { %v1936_v2 = vpop.eup %1935  ;;  %1710 = vmatprep.mubr.f32.mxu0 %v617_v11  ;;  %v619_v41 = vmul.f32 %v1934_v53, %v2636_v62 }
 0x1de   : > { %v594_v34 = vpop.xlane.xlu1 %593  ;;  %v592_v57 = vpop.xlane.xlu0 %591  ;;  %v618_v22 = vmul.f32 %v1936_v2, %v2633_v26 }
 0x1df   : > { %1949 = vrcp.f32 %v594_v34  ;;  %635 = vst [vmem:[%s2738_s12 + $0x30] sm:$0xff] %v619_v41 }
 0x1e0   : > { %v1938_v10 = vpop.eup %1937  ;;  %1951 = vrcp.f32 %v592_v57  ;;  %634 = vst [vmem:[%s2738_s12 + $0x28] sm:$0xff] %v618_v22  ;;  %1711 = vmatmul.mubr.f32.gmra.mxu0 %v618_v22 }
 0x1e1   : > { %v1940_v6 = vpop.eup %1939  ;;  %1713 = vmatprep.mubr.f32.mxu0 %v619_v41  ;;  %v621_v42 = vmul.f32 %v1938_v10, %v2645_v8 }
 0x1e2   : > { %v596_v7 = vpop.xlane.xlu0 %595  ;;  %v620_v62 = vmul.f32 %v1940_v6, %v2642_v47 }
 0x1e3   : > { %1953 = vrcp.f32 %v596_v7  ;;  %637 = vst [vmem:[%s2738_s12 + $0x40] sm:$0xff] %v621_v42 }
 0x1e4   : > { %v1942_v16 = vpop.eup %1941  ;;  %636 = vst [vmem:[%s2738_s12 + $0x38] sm:$0xff] %v620_v62  ;;  %1714 = vmatmul.mubr.f32.gmra.mxu0 %v620_v62 }
 0x1e5   : > { %v1944_v26 = vpop.eup %1943  ;;  %1716 = vmatprep.mubr.f32.mxu0 %v621_v42  ;;  %v623_v43 = vmul.f32 %v1942_v16, %v2652_v14 }
 0x1e6   : > { %v622_v63 = vmul.f32 %v1944_v26, %v2650_v49 }
 0x1e7   : > { %639 = vst [vmem:[%s2738_s12 + $0x50] sm:$0xff] %v623_v43 }
 0x1e8   : > { %v1946_v27 = vpop.eup %1945  ;;  %638 = vst [vmem:[%s2738_s12 + $0x48] sm:$0xff] %v622_v63  ;;  %1717 = vmatmul.mubr.f32.gmra.mxu0 %v622_v63 }
 0x1e9   : > { %v1948_v47 = vpop.eup %1947  ;;  %1719 = vmatprep.mubr.f32.mxu0 %v623_v43  ;;  %v625_v8 = vmul.f32 %v1946_v27, %v2660_v50 }
 0x1ea   : > { %v624_v1 = vmul.f32 %v1948_v47, %v2657_v48 }
 0x1eb   : > { %641 = vst [vmem:[%s2738_s12 + $0x60] sm:$0xff] %v625_v8 }
 0x1ec   : > { %v1950_v0 = vpop.eup %1949  ;;  %640 = vst [vmem:[%s2738_s12 + $0x58] sm:$0xff] %v624_v1  ;;  %1720 = vmatmul.mubr.f32.gmra.mxu0 %v624_v1 }
 0x1ed   : > { %v1952_v14 = vpop.eup %1951  ;;  %1722 = vmatprep.mubr.f32.mxu0 %v625_v8  ;;  %v627_v49 = vmul.f32 %v1950_v0, %v2667_v55 }
 0x1ee   : > { %v626_v21 = vmul.f32 %v1952_v14, %v2665_v19 }
 0x1ef   : > { %643 = vst [vmem:[%s2738_s12 + $0x70] sm:$0xff] %v627_v49 }
 0x1f0   : > { %v1954_v4 = vpop.eup %1953  ;;  %642 = vst [vmem:[%s2738_s12 + $0x68] sm:$0xff] %v626_v21  ;;  %1723 = vmatmul.mubr.f32.gmra.mxu0 %v626_v21 }
 0x1f1   : > { %1725 = vmatprep.mubr.f32.mxu0 %v627_v49  ;;  %v628_v50 = vmul.f32 %v1954_v4, %v2673_v38 }
 0x1f3   : > { %644 = vst [vmem:[%s2738_s12 + $0x78] sm:$0xff] %v628_v50 }
 0x1f4   : > { %1726 = vmatmul.mubr.f32.gmra.mxu0 %v628_v50 }
 0x204   : > { %v1073_v48 = vpop.trf.xlu1 }
 0x205   : > { %1250 = vst [vmem:[%s2772_s29] sm:$0xff] %v1073_v48  ;;  %1760 = vmatprep.mubr.f32.mxu1 %v1073_v48 }
 0x208   : > { %v1074_v19 = vpop.trf.xlu1 }
 0x209   : > { %1251 = vst [vmem:[%s2772_s29 + $0x8] sm:$0xff] %v1074_v19  ;;  %1761 = vmatmul.mubr.f32.vlgmr.msra.gmra.mxu1 %v1074_v19 }
 0x20c   : > { %v1075_v55 = vpop.trf.xlu1 }
 0x20d   : > { %1252 = vst [vmem:[%s2772_s29 + $0x10] sm:$0xff] %v1075_v55  ;;  %1763 = vmatprep.mubr.f32.mxu1 %v1075_v55 }
 0x210   : > { %v1076_v38 = vpop.trf.xlu1 }
 0x211   : > { %1253 = vst [vmem:[%s2772_s29 + $0x18] sm:$0xff] %v1076_v38  ;;  %1764 = vmatmul.mubr.f32.gmra.mxu1 %v1076_v38 }
 0x214   : > { %v1077_v46 = vpop.trf.xlu1 }
 0x215   : > { %1254 = vst [vmem:[%s2772_s29 + $0x20] sm:$0xff] %v1077_v46  ;;  %1766 = vmatprep.mubr.f32.mxu1 %v1077_v46 }
 0x218   : > { %v1078_v30 = vpop.trf.xlu1 }
 0x219   : > { %1255 = vst [vmem:[%s2772_s29 + $0x28] sm:$0xff] %v1078_v30  ;;  %1767 = vmatmul.mubr.f32.gmra.mxu1 %v1078_v30 }
 0x21c   : > { %v1079_v25 = vpop.trf.xlu1 }
 0x21d   : > { %1256 = vst [vmem:[%s2772_s29 + $0x30] sm:$0xff] %v1079_v25  ;;  %1769 = vmatprep.mubr.f32.mxu1 %v1079_v25 }
 0x220   : > { %v1080_v18 = vpop.trf.xlu1 }
 0x221   : > { %1257 = vst [vmem:[%s2772_s29 + $0x38] sm:$0xff] %v1080_v18  ;;  %1770 = vmatmul.mubr.f32.gmra.mxu1 %v1080_v18 }
 0x224   : > { %v1081_v28 = vpop.trf.xlu1 }
 0x225   : > { %1258 = vst [vmem:[%s2772_s29 + $0x40] sm:$0xff] %v1081_v28  ;;  %1772 = vmatprep.mubr.f32.mxu1 %v1081_v28 }
 0x228   : > { %v1082_v5 = vpop.trf.xlu1 }
 0x229   : > { %1259 = vst [vmem:[%s2772_s29 + $0x48] sm:$0xff] %v1082_v5  ;;  %1773 = vmatmul.mubr.f32.gmra.mxu1 %v1082_v5 }
 0x22c   : > { %v1083_v9 = vpop.trf.xlu1 }
 0x22d   : > { %1260 = vst [vmem:[%s2772_s29 + $0x50] sm:$0xff] %v1083_v9  ;;  %1775 = vmatprep.mubr.f32.mxu1 %v1083_v9 }
 0x230   : > { %v1084_v29 = vpop.trf.xlu1 }
 0x231   : > { %1261 = vst [vmem:[%s2772_s29 + $0x58] sm:$0xff] %v1084_v29  ;;  %1776 = vmatmul.mubr.f32.gmra.mxu1 %v1084_v29 }
 0x234   : > { %v1085_v44 = vpop.trf.xlu1 }
 0x235   : > { %1262 = vst [vmem:[%s2772_s29 + $0x60] sm:$0xff] %v1085_v44  ;;  %1778 = vmatprep.mubr.f32.mxu1 %v1085_v44 }
 0x238   : > { %v1086_v51 = vpop.trf.xlu1 }
 0x239   : > { %1263 = vst [vmem:[%s2772_s29 + $0x68] sm:$0xff] %v1086_v51  ;;  %1779 = vmatmul.mubr.f32.gmra.mxu1 %v1086_v51 }
 0x23c   : > { %v1087_v56 = vpop.trf.xlu1 }
 0x23d   : > { %1264 = vst [vmem:[%s2772_s29 + $0x70] sm:$0xff] %v1087_v56  ;;  %1781 = vmatprep.mubr.f32.mxu1 %v1087_v56 }
 0x240   : > { %v1088_v59 = vpop.trf.xlu1 }
 0x241   : > { %1265 = vst [vmem:[%s2772_s29 + $0x78] sm:$0xff] %v1088_v59  ;;  %1782 = vmatmul.mubr.f32.gmra.mxu1 %v1088_v59 }
 0x242   : > { %2024 = shalt.err (!%p2021_p9)
}
 0x243   : > { %s2025_s26 = scalar_lea.hbm %s2798_s22, 2048  ;;  %s2029_s21 = scalar_lea.hbm %s2992_s6, 4096 }
 0x244   : > { %p2026_p11 = scmp.ne.s32.totalorder %s2798_s22, %s2025_s26  ;;  %p2030_p8 = scmp.lt.s32.totalorder %s2798_s22, %s2992_s6 }
 0x245   : > { %p2031_p6 = scmp.lt.s32.totalorder %s2029_s21, %s2025_s26 }
 0x246   : > { %p2027_p3 = pnand %p2026_p11, %p3019_p12 }
 0x247   : > { %p2032_p13 = por %p2031_p6, %p2030_p8 }
 0x248   : > { %p2028_p5 = pneg %p2027_p3 }
 0x24a   : > { %p2033_p1 = pnand %p2032_p13, %p2028_p5 }
 0x24c   : > { %2036 = shalt.err (!%p2033_p1)
}
 0x24d   : > { %s3002_s14 = smov 128   ;;  %s2174_s9 = smov 8  }
 0x24e   : > { %1789 = dma.vmem_to_hbm [thread:$0]  (%p3019_p12), %s2801_s3, 2048, %s2798_s22, %s2803_s16, %s3002_s14, %s3002_s14, %s2174_s9  }
 0x24f   : > { %s2833_s26 = scalar_lea.hbm %s2994_s8, %s2792_s13  ;;  %s1343_s25 = sshll.u32 %s2772_s29, 4  ;;  %s2836_s25 = int_to_ptr.vmem [resolvable:$true] %s1343_s25 }
 0x250   : > { %s1282_s12 = scalar_lea.sflag [#allocation12], %s2381_s20  ;;  %s2037_s21 = scalar_lea.vmem %s2836_s25, 2048 }
 0x251   : > { %p2038_p7 = scmp.ne.s32.totalorder %s2836_s25, %s2037_s21  ;;  %s2175_s23 = smov [#allocation11]  }
 0x252   : > { %s2041_s24 = sshll.u32 %s2175_s23, 4  ;;  %s2042_s24 = int_to_ptr.vmem [resolvable:$false] %s2041_s24 }
 0x253   : > { %p2039_p10 = pnand %p2038_p7, %p3019_p12  ;;  %s2043_s22 = scalar_lea.vmem %s2042_s24, 4096 }
 0x254   : > { %p2044_p2 = scmp.lt.s32.totalorder %s2836_s25, %s2042_s24  ;;  %p2045_p4 = scmp.lt.s32.totalorder %s2043_s22, %s2037_s21 }
 0x255   : > { %p2040_p0 = pneg %p2039_p10 }
 0x256   : > { %p2046_p9 = por %p2045_p4, %p2044_p2 }
 0x258   : > { %p2047_p11 = pnand %p2046_p9, %p2040_p0 }
 0x25a   : > { %2050 = shalt.err (!%p2047_p11)
}
 0x25b   : > { %s2051_s29 = scalar_lea.hbm %s2833_s26, 2048  ;;  %s2055_s10 = scalar_lea.hbm %s2994_s8, 4096 }
 0x25c   : > { %p2052_p3 = scmp.ne.s32.totalorder %s2833_s26, %s2051_s29  ;;  %p2056_p6 = scmp.lt.s32.totalorder %s2833_s26, %s2994_s8 }
 0x25d   : > { %p2057_p13 = scmp.lt.s32.totalorder %s2055_s10, %s2051_s29 }
 0x25e   : > { %p2053_p5 = pnand %p2052_p3, %p3019_p12 }
 0x25f   : > { %p2058_p1 = por %p2057_p13, %p2056_p6 }
 0x260   : > { %p2054_p8 = pneg %p2053_p5 }
 0x262   : > { %p2059_p7 = pnand %p2058_p1, %p2054_p8 }
 0x264   : > { %2062 = shalt.err (!%p2059_p7)
}
 0x265   : > { %s3020_s21 = smov 128   ;;  %s2863_s24 = scalar_lea.vmem [#allocation7], %s2384_s15 }
 0x266   : > { %1791 = dma.vmem_to_hbm [thread:$0]  (%p3019_p12), %s2836_s25, 2048, %s2833_s26, %s1282_s12, %s3020_s21, %s3020_s21, %s2174_s9  }
 0x267   : > { %s1295_s14 = sshll.u32 %s2863_s24, 4  ;;  %s2885_s12 = scalar_lea.hbm %s2991_s5, %s2792_s13  ;;  %s2887_s14 = int_to_ptr.vmem [resolvable:$true] %s1295_s14 }
 0x268   : > { %s1267_s22 = scalar_lea.sflag [#allocation4], %s2381_s20  ;;  %s2063_s29 = scalar_lea.vmem %s2887_s14, 2048 }
 0x269   : > { %p2064_p10 = scmp.ne.s32.totalorder %s2887_s14, %s2063_s29  ;;  %s2176_s3 = smov [#allocation7]  }
 0x26a   : > { %s2067_s19 = sshll.u32 %s2176_s3, 4  ;;  %s2068_s19 = int_to_ptr.vmem [resolvable:$false] %s2067_s19 }
 0x26b   : > { %p2065_p0 = pnand %p2064_p10, %p3019_p12  ;;  %s2069_s10 = scalar_lea.vmem %s2068_s19, 4096 }
 0x26c   : > { %p2070_p4 = scmp.lt.s32.totalorder %s2887_s14, %s2068_s19  ;;  %p2071_p9 = scmp.lt.s32.totalorder %s2069_s10, %s2063_s29 }
 0x26d   : > { %p2066_p2 = pneg %p2065_p0 }
 0x26e   : > { %p2072_p11 = por %p2071_p9, %p2070_p4 }
 0x270   : > { %p2073_p3 = pnand %p2072_p11, %p2066_p2 }
 0x297   : > { %v1706_v12 = vpop.f32.mrf.mxu0 }
 0x298   : > { %807 = vst [vmem:[%s2863_s24 + $0x8] sm:$0xff] %v1706_v12 }
 0x299   : > { %v727_v3 = vpop.f32.mrf.mxu0 }
 0x29a   : > { %806 = vst [vmem:[%s2863_s24] sm:$0xff] %v727_v3 }
 0x29c   : > { %v1709_v17 = vpop.f32.mrf.mxu0 }
 0x29d   : > { %809 = vst [vmem:[%s2863_s24 + $0x18] sm:$0xff] %v1709_v17 }
 0x29e   : > { %v737_v32 = vpop.f32.mrf.mxu0 }
 0x29f   : > { %808 = vst [vmem:[%s2863_s24 + $0x10] sm:$0xff] %v737_v32 }
 0x2a0   : > { %v1712_v20 = vpop.f32.mrf.mxu0 }
 0x2a1   : > { %811 = vst [vmem:[%s2863_s24 + $0x28] sm:$0xff] %v1712_v20 }
 0x2a2   : > { %v747_v15 = vpop.f32.mrf.mxu0 }
 0x2a3   : > { %810 = vst [vmem:[%s2863_s24 + $0x20] sm:$0xff] %v747_v15 }
 0x2a4   : > { %v1715_v24 = vpop.f32.mrf.mxu0 }
 0x2a5   : > { %813 = vst [vmem:[%s2863_s24 + $0x38] sm:$0xff] %v1715_v24 }
 0x2a6   : > { %v757_v37 = vpop.f32.mrf.mxu0 }
 0x2a7   : > { %812 = vst [vmem:[%s2863_s24 + $0x30] sm:$0xff] %v757_v37 }
 0x2a8   : > { %v1718_v40 = vpop.f32.mrf.mxu0 }
 0x2a9   : > { %815 = vst [vmem:[%s2863_s24 + $0x48] sm:$0xff] %v1718_v40 }
 0x2aa   : > { %v767_v45 = vpop.f32.mrf.mxu0 }
 0x2ab   : > { %814 = vst [vmem:[%s2863_s24 + $0x40] sm:$0xff] %v767_v45 }
 0x2ac   : > { %v1721_v35 = vpop.f32.mrf.mxu0 }
 0x2ad   : > { %817 = vst [vmem:[%s2863_s24 + $0x58] sm:$0xff] %v1721_v35 }
 0x2ae   : > { %v777_v52 = vpop.f32.mrf.mxu0 }
 0x2af   : > { %816 = vst [vmem:[%s2863_s24 + $0x50] sm:$0xff] %v777_v52 }
 0x2b0   : > { %v1724_v33 = vpop.f32.mrf.mxu0 }
 0x2b1   : > { %819 = vst [vmem:[%s2863_s24 + $0x68] sm:$0xff] %v1724_v33 }
 0x2b2   : > { %v787_v54 = vpop.f32.mrf.mxu0 }
 0x2b3   : > { %818 = vst [vmem:[%s2863_s24 + $0x60] sm:$0xff] %v787_v54 }
 0x2b4   : > { %v1727_v58 = vpop.f32.mrf.mxu0 }
 0x2b5   : > { %821 = vst [vmem:[%s2863_s24 + $0x78] sm:$0xff] %v1727_v58 }
 0x2b6   : > { %v797_v39 = vpop.f32.mrf.mxu0 }
 0x2b7   : > { %820 = vst [vmem:[%s2863_s24 + $0x70] sm:$0xff] %v797_v39 }
 0x2b8   : > { %2076 = shalt.err (!%p2073_p3)
}
 0x2b9   : > { %s2077_s23 = scalar_lea.hbm %s2885_s12, 2048  ;;  %s2081_s26 = scalar_lea.hbm %s2991_s5, 4096 }
 0x2ba   : > { %p2078_p5 = scmp.ne.s32.totalorder %s2885_s12, %s2077_s23  ;;  %p2082_p13 = scmp.lt.s32.totalorder %s2885_s12, %s2991_s5 }
 0x2bb   : > { %p2083_p1 = scmp.lt.s32.totalorder %s2081_s26, %s2077_s23 }
 0x2bc   : > { %p2079_p8 = pnand %p2078_p5, %p3019_p12 }
 0x2bd   : > { %p2084_p7 = por %p2083_p1, %p2082_p13 }
 0x2be   : > { %p2080_p6 = pneg %p2079_p8 }
 0x2c0   : > { %p2085_p10 = pnand %p2084_p7, %p2080_p6 }
 0x2c2   : > { %2088 = shalt.err (!%p2085_p10)
}
 0x2c3   : > { %1788 = dma.vmem_to_hbm [thread:$0]  (%p3019_p12), %s2887_s14, 2048, %s2885_s12, %s1267_s22, %s3020_s21, %s3020_s21, %s2174_s9  }
 0x2c4   : > { %s2915_s29 = scalar_lea.vmem [#allocation10], %s2384_s15  ;;  %s2937_s22 = scalar_lea.hbm %s2993_s7, %s2792_s13 }
 0x2c5   : > { %s1327_s15 = sshll.u32 %s2915_s29, 4  ;;  %s2177_s10 = smov [#allocation10]   ;;  %s2939_s15 = int_to_ptr.vmem [resolvable:$true] %s1327_s15 }
 0x2c6   : > { %s2089_s19 = scalar_lea.vmem %s2939_s15, 2048  ;;  %s2093_s23 = sshll.u32 %s2177_s10, 4  ;;  %s2094_s23 = int_to_ptr.vmem [resolvable:$false] %s2093_s23 }
 0x2c7   : > { %p2090_p0 = scmp.ne.s32.totalorder %s2939_s15, %s2089_s19  ;;  %s2095_s20 = scalar_lea.vmem %s2094_s23, 4096 }
 0x2c8   : > { %p2096_p9 = scmp.lt.s32.totalorder %s2939_s15, %s2094_s23  ;;  %p2097_p11 = scmp.lt.s32.totalorder %s2095_s20, %s2089_s19 }
 0x2c9   : > { %v1762_v31 = vpop.f32.mrf.mxu1  ;;  %p2091_p2 = pnand %p2090_p0, %p3019_p12 }
 0x2ca   : > { %1235 = vst [vmem:[%s2915_s29 + $0x8] sm:$0xff] %v1762_v31  ;;  %p2098_p3 = por %p2097_p11, %p2096_p9 }
 0x2cb   : > { %v1155_v60 = vpop.f32.mrf.mxu1  ;;  %p2092_p4 = pneg %p2091_p2 }
 0x2cc   : > { %1234 = vst [vmem:[%s2915_s29] sm:$0xff] %v1155_v60 }
 0x2cd   : > { %p2099_p5 = pnand %p2098_p3, %p2092_p4 }
 0x2d1   : > { %v1765_v61 = vpop.f32.mrf.mxu1 }
 0x2d2   : > { %1237 = vst [vmem:[%s2915_s29 + $0x18] sm:$0xff] %v1765_v61 }
 0x2d3   : > { %v1165_v11 = vpop.f32.mrf.mxu1 }
 0x2d4   : > { %1236 = vst [vmem:[%s2915_s29 + $0x10] sm:$0xff] %v1165_v11 }
 0x2d9   : > { %v1768_v23 = vpop.f32.mrf.mxu1 }
 0x2da   : > { %1239 = vst [vmem:[%s2915_s29 + $0x28] sm:$0xff] %v1768_v23 }
 0x2db   : > { %v1175_v13 = vpop.f32.mrf.mxu1 }
 0x2dc   : > { %1238 = vst [vmem:[%s2915_s29 + $0x20] sm:$0xff] %v1175_v13 }
 0x2e1   : > { %v1771_v36 = vpop.f32.mrf.mxu1 }
 0x2e2   : > { %1241 = vst [vmem:[%s2915_s29 + $0x38] sm:$0xff] %v1771_v36 }
 0x2e3   : > { %v1185_v53 = vpop.f32.mrf.mxu1 }
 0x2e4   : > { %1240 = vst [vmem:[%s2915_s29 + $0x30] sm:$0xff] %v1185_v53 }
 0x2e9   : > { %v1774_v2 = vpop.f32.mrf.mxu1 }
 0x2ea   : > { %1243 = vst [vmem:[%s2915_s29 + $0x48] sm:$0xff] %v1774_v2 }
 0x2eb   : > { %v1195_v41 = vpop.f32.mrf.mxu1 }
 0x2ec   : > { %1242 = vst [vmem:[%s2915_s29 + $0x40] sm:$0xff] %v1195_v41 }
 0x2f1   : > { %v1777_v34 = vpop.f32.mrf.mxu1 }
 0x2f2   : > { %1245 = vst [vmem:[%s2915_s29 + $0x58] sm:$0xff] %v1777_v34 }
 0x2f3   : > { %v1205_v57 = vpop.f32.mrf.mxu1 }
 0x2f4   : > { %1244 = vst [vmem:[%s2915_s29 + $0x50] sm:$0xff] %v1205_v57 }
 0x2f9   : > { %v1780_v22 = vpop.f32.mrf.mxu1 }
 0x2fa   : > { %1247 = vst [vmem:[%s2915_s29 + $0x68] sm:$0xff] %v1780_v22 }
 0x2fb   : > { %v1215_v10 = vpop.f32.mrf.mxu1 }
 0x2fc   : > { %1246 = vst [vmem:[%s2915_s29 + $0x60] sm:$0xff] %v1215_v10 }
 0x301   : > { %v1783_v6 = vpop.f32.mrf.mxu1 }
 0x302   : > { %1249 = vst [vmem:[%s2915_s29 + $0x78] sm:$0xff] %v1783_v6 }
 0x303   : > { %v1225_v42 = vpop.f32.mrf.mxu1 }
 0x304   : > { %1248 = vst [vmem:[%s2915_s29 + $0x70] sm:$0xff] %v1225_v42 }
 0x305   : > { %2102 = shalt.err (!%p2099_p5)
}
 0x306   : > { %s2103_s13 = scalar_lea.hbm %s2937_s22, 2048  ;;  %s2107_s25 = scalar_lea.hbm %s2993_s7, 4096 }
 0x307   : > { %p2104_p8 = scmp.ne.s32.totalorder %s2937_s22, %s2103_s13  ;;  %p2108_p1 = scmp.lt.s32.totalorder %s2937_s22, %s2993_s7 }
 0x308   : > { %p2109_p7 = scmp.lt.s32.totalorder %s2107_s25, %s2103_s13 }
 0x309   : > { %p2105_p6 = pnand %p2104_p8, %p3019_p12 }
 0x30a   : > { %p2110_p10 = por %p2109_p7, %p2108_p1 }
 0x30b   : > { %p2106_p13 = pneg %p2105_p6 }
 0x30d   : > { %p2111_p0 = pnand %p2110_p10, %p2106_p13 }
 0x30f   : > { %2114 = shalt.err (!%p2111_p0)
}
 0x310   : > { %1790 = dma.vmem_to_hbm [thread:$0]  (%p3019_p12), %s2939_s15, 2048, %s2937_s22, %s2803_s16, %s3020_s21, %s3020_s21, %s2174_s9  }
 0x311 PF: > { %s1358_s14 = sand.u32 1, %s2153_s27   ;;  %p3021_p2 = scmp.ne.s32.totalorder %s3010_s18, 0 }
 0x312   : > { %p3022_p4 = scmp.ge.s32.totalorder %s2165_s30, 2  ;;  %s1359_s12 = scalar_lea.sflag [#allocation4], %s1358_s14 }
 0x314   : > { %p1804_p9 = pnand %p3022_p4, %p3021_p2 }
 0x316   : > { %p1805_p11 = pneg %p1804_p9 }
 0x318   : > { %2140 = dma.done.wait (%p1805_p11), %s1359_s12, 2048  }
 0x319   : > { %2142 = vsyncadd (%p1805_p11), %s1359_s12, 4294965248  ;;  %s3023_s17 = sadd.s32 4294967294, %s2165_s30  }
 0x31a   : > { %s1367_s19 = sand.u32 1, %s3023_s17  }
 0x31b   : > { %s1368_s10 = scalar_lea.sflag [#allocation9], %s1367_s19 }
 0x31c   : > { %2144 = dma.done.wait (%p1805_p11), %s1368_s10, 4096  }
 0x31d   : > { %2146 = vsyncadd (%p1805_p11), %s1368_s10, 4294963200  ;;  %s1386_s23 = scalar_lea.sflag [#allocation12], %s1358_s14 }
 0x31e   : > { %2148 = dma.done.wait (%p1805_p11), %s1386_s23, 2048  }
 0x31f   : > { %2150 = vsyncadd (%p1805_p11), %s1386_s23, 4294965248  ;;  %s3024_s16 = sld [smem:[#allocation18_spill]]  ;;  %p31_p12 = scmp.ge.s32.totalorder %s2248_s11, 4  }
 0x320   : > { %s3025_s29 = sld [smem:[#allocation19_spill]]  ;;  %s3026_s27 = smov %s2157_s28 }
 0x321   : > { %s3028_s30 = smov %s2248_s11  ;;  %33 = sbr.rel (!%p31_p12) target bundleno = 13 (0xd), region = 156 }
 0x325   : > { %s3027_s28 = smov %s3024_s16 }
 0x326   :  { %1391 = vsyncpa [#allocation3], 1 }
 0x327   :  { %1393 = vsyncpa [#allocation3 + $0x1], 1 }
 0x328   :  { %1394 = vsyncpa [#allocation6], 1 }
 0x329   :  { %1396 = vsyncpa [#allocation6 + $0x1], 1 }
 0x32a   :  { %1397 = vsyncpa [#allocation4], 1 }
 0x32b   :  { %1399 = vsyncpa [#allocation4 + $0x1], 1 }
 0x32c   :  { %1400 = vsyncpa [#allocation9], 1 }
 0x32d   :  { %1402 = vsyncpa [#allocation9 + $0x1], 1 }
 0x32e   :  { %1403 = vsyncpa [#allocation12], 1 }
 0x32f   :  { %1405 = vsyncpa [#allocation12 + $0x1], 1 }

</bundles_post_ra>
